<compile_context>
chip_gen: v6e
topology: v6e:2x2x1
jax: 0.10.0
libtpu: 0.0.40
codegen_flags: <defaults>
</compile_context>

<pallas_src>
import functools
import math

import numpy as np
import jax
import jax.numpy as jnp
from jax.experimental import pallas as pl
from jax.experimental.pallas import tpu as pltpu


def _pair(v):
    return tuple(v) if isinstance(v, (tuple, list)) else (v, v)


def _round_up(x, m):
    return (x + m - 1) // m * m


# ---------------------------------------------------------------------------
# Group / filter-index construction (equivalent of groupy's make_*_indices).
# inds[g_out, s_in, u, v] = (s', u', v') : where to read the original filter
# to build the filter transformed by output-group element g_out.
# ---------------------------------------------------------------------------
def _group_spatial_mats(name):
    R = np.array([[0, -1], [1, 0]], dtype=np.int64)   # 90-degree rotation on centered (row, col)
    M = np.array([[1, 0], [0, -1]], dtype=np.int64)   # mirror (flip columns)
    if name == "Z2":
        return [np.eye(2, dtype=np.int64)]
    if name == "C4":
        return [np.linalg.matrix_power(R, r) for r in range(4)]
    if name == "D4":
        return [np.linalg.matrix_power(R, r) @ np.linalg.matrix_power(M, m)
                for m in range(2) for r in range(4)]
    raise ValueError(name)


def make_filter_indices(g_input, g_output, ksize):
    if (g_input, g_output) not in (("Z2", "C4"), ("C4", "C4"), ("Z2", "D4"), ("D4", "D4")):
        raise ValueError(f"unsupported g_input/g_output pair: {(g_input, g_output)}")
    # TODO(synk): even kernel sizes use groupy's C4 half-shift indices; only odd ksize here.
    assert ksize % 2 == 1, "only odd kernel sizes supported"
    out_mats = _group_spatial_mats(g_output)
    in_mats = _group_spatial_mats(g_input)
    nto, nti = len(out_mats), len(in_mats)
    c = ksize // 2
    inds = np.zeros((nto, nti, ksize, ksize, 3), dtype=np.int32)
    for gi, A in enumerate(out_mats):
        Ainv = np.rint(np.linalg.inv(A)).astype(np.int64)
        for si, S in enumerate(in_mats):
            if g_input == "Z2":
                sp = 0
            else:
                B = Ainv @ S
                sp = next(t for t, T in enumerate(in_mats) if np.array_equal(T, B))
            for u in range(ksize):
                for v in range(ksize):
                    q = Ainv @ np.array([u - c, v - c], dtype=np.int64)
                    up, vp = int(q[0] + c), int(q[1] + c)
                    assert 0 <= up < ksize and 0 <= vp < ksize
                    inds[gi, si, u, v] = (sp, up, vp)
    return nti, nto, inds


# ---------------------------------------------------------------------------
# Pallas kernel: one batch BAND (bb images) per grid step, per-tap MXU accumulation.
#   out[b, co, :] = sum_t  W[t, co, :] @ x[b, :, off_t : off_t + s]  + bias[co]
# ---------------------------------------------------------------------------
def _gconv2d_kernel(x_ref, w_ref, b_ref, o_ref, *, kh, kw, wp, s_blk, bb):
    # x_ref : (bb, cin, l)        bf16  row-major flattened zero-padded images (row pitch wp)
    # w_ref : (kh*kw, cout, cin)  bf16  transformed filters, one (cout, cin) matrix per tap
    # b_ref : (cout, 1)           f32
    # o_ref : (bb, cout, s_blk)   f32 or bf16; s_blk = round_up(ho*wp, 128) -> unmasked stores
    bias = b_ref[...]                                   # (cout, 1) f32
    for b in range(bb):                                 # static unroll; whole band in one step
        x = x_ref[b]                                    # (cin, l) bf16
        acc = None
        for t in range(kh * kw):                        # static unroll, kh*kw small
            i, j = divmod(t, kw)
            off = i * wp + j                            # static lane offset into the flat image
            # K = cin exactly (no zero-K padding); bf16 operands, f32 accumulation on the MXU.
            part = jnp.dot(w_ref[t], x[:, off:off + s_blk],
                           preferred_element_type=jnp.float32)      # (cout, s_blk) f32
            acc = part if acc is None else acc + part
        o_ref[b] = (acc + bias).astype(o_ref.dtype)     # f32 bias add, cast on store


def pallas_gconv2d(x_nchw, w_taps, bias_col, *, kh, kw, ph, pw,
                   out_dtype=jnp.float32, batch_block=None):
    """Stride-1 2-D conv. x_nchw (N,Cin,H,W) float, w_taps (kh*kw, Cout, Cin) bf16,
    bias_col (Cout,1) f32. Returns ((N_pad, Cout, s_blk) out_dtype, geometry)."""
    n, cin, h, w = x_nchw.shape
    ntaps, cout, cin_w = w_taps.shape
    assert ntaps == kh * kw and cin_w == cin

    hp, wpc = h + 2 * ph, w + 2 * pw
    ho, wo = hp - kh + 1, wpc - kw + 1
    assert ho > 0 and wo > 0
    wp = _round_up(wpc, 8)                         # lane-friendly row pitch
    s_blk = _round_up(ho * wp, 128)                # lane-dense output width (review #7)
    max_off = (kh - 1) * wp + (kw - 1)
    l = _round_up(max(max_off + s_blk, hp * wp), 128)

    out_bytes = np.dtype(out_dtype).itemsize
    # Batch folding (review #1): as many images per grid step as a conservative VMEM budget
    # allows; for small N this folds the whole batch into one kernel invocation.
    if batch_block is None:
        per_img = 2 * cin * l * 2 + 2 * cout * s_blk * out_bytes + cout * s_blk * 4
        budget = 24 * 1024 * 1024
        batch_block = max(1, min(n, budget // max(per_img, 1)))
    bb = int(batch_block)
    num_bands = -(-n // bb)
    n_pad = num_bands * bb
    # TODO(synk): on v7x (2 TensorCores) prefer >=2 batch bands / an output-row band axis (with
    # kh-1 halo rows) once the per-step work is big enough to amortize the extra grid steps.

    # bf16 at the kernel boundary; one spatial pad (conv pad + row-pitch alignment) plus one flat
    # pad so every tap's [off : off+s_blk] slice stays in bounds.
    xb = x_nchw.astype(jnp.bfloat16)
    xb = jnp.pad(xb, ((0, n_pad - n), (0, 0), (ph, ph), (pw, wp - w - pw)))
    x_flat = xb.reshape(n_pad, cin, hp * wp)                 # free reshape of trailing dims
    x_flat = jnp.pad(x_flat, ((0, 0), (0, 0), (0, l - hp * wp)))

    kernel = functools.partial(_gconv2d_kernel, kh=kh, kw=kw, wp=wp, s_blk=s_blk, bb=bb)

    flops = 2 * n_pad * cout * kh * kw * cin * s_blk
    bytes_accessed = int(x_flat.size * 2 + w_taps.size * 2 + bias_col.size * 4
                         + n_pad * cout * s_blk * out_bytes)
    block_bytes = (2 * bb * cin * l * 2                 # x block (double-buffered)
                   + kh * kw * cout * cin * 2           # weights (same block -> fetched once)
                   + cout * 4
                   + 2 * bb * cout * s_blk * out_bytes  # out block (double-buffered)
                   + bb * cout * s_blk * 4)             # f32 accumulator temporaries
    # Review #2: never request the full 64 MiB of v7x VMEM; cap at 48 MiB to leave headroom.
    vmem_limit = int(min(48 * 1024 * 1024, max(8 * 1024 * 1024, 4 * block_bytes)))

    y_flat = pl.pallas_call(
        kernel,
        out_shape=jax.ShapeDtypeStruct((n_pad, cout, s_blk), out_dtype),
        grid_spec=pltpu.PrefetchScalarGridSpec(
            num_scalar_prefetch=0,
            grid=(num_bands,),
            in_specs=[
                pl.BlockSpec((bb, cin, l), lambda i: (i, 0, 0)),
                pl.BlockSpec((kh * kw, cout, cin), lambda i: (0, 0, 0)),  # fetched once
                pl.BlockSpec((cout, 1), lambda i: (0, 0)),
            ],
            out_specs=pl.BlockSpec((bb, cout, s_blk), lambda i: (i, 0, 0)),
        ),
        compiler_params=pltpu.CompilerParams(
            dimension_semantics=("parallel",),
            vmem_limit_bytes=vmem_limit),
        cost_estimate=pl.CostEstimate(flops=flops, transcendentals=0,
                                      bytes_accessed=bytes_accessed),
    )(x_flat, w_taps, bias_col)
    return y_flat, (ho, wo, wp, s_blk, n_pad)


# ---------------------------------------------------------------------------
# SplitGConv2d module (JAX/Pallas).
# ---------------------------------------------------------------------------
class SplitGConv2dPallas:
    def __init__(self, g_input, g_output, in_channels, out_channels,
                 kernel_size=3, stride=1, padding=0, bias=True, *,
                 key, out_dtype=jnp.float32):
        self.ksize = kernel_size
        self.kernel_size = _pair(kernel_size)
        self.stride = _pair(stride)
        self.padding = _pair(padding)
        self.g_input = g_input
        self.g_output = g_output
        self.nti, self.nto, self.inds = make_filter_indices(g_input, g_output, self.ksize)
        self.in_channels = in_channels
        self.out_channels = out_channels
        self.out_dtype = out_dtype

        k_w, k_b = jax.random.split(key)
        # PyTorch: reset_parameters() (uniform) then init.xavier_normal_ overrides the weight.
        fan_in = in_channels * self.nti * self.ksize * self.ksize
        fan_out = out_channels * self.nti * self.ksize * self.ksize
        xavier_std = math.sqrt(2.0 / (fan_in + fan_out))
        self.weight = xavier_std * jax.random.normal(
            k_w, (out_channels, in_channels, self.nti, self.ksize, self.ksize), jnp.float32)
        if bias:
            stdv = 1.0 / math.sqrt(in_channels * self.ksize * self.ksize)
            self.bias = jax.random.uniform(k_b, (out_channels,), jnp.float32, -stdv, stdv)
        else:
            self.bias = None

        # ---- hoisted out of the forward hot path ----
        cin = in_channels * self.nti
        cout = out_channels * self.nto
        self.cin, self.cout = cin, cout
        kh, kw = self.kernel_size
        tw = self._transform_filter(self.weight)                  # (cout, cin, kh, kw) f32
        # (kh*kw, cout, cin): one (cout, cin) matrix per tap -> per-tap MXU dots with K = cin
        # exactly (no 16-row channel pad -> no zero-K work for the cin=4 first layer, review #4).
        self._w_taps = (jnp.transpose(tw, (2, 3, 0, 1))
                        .reshape(kh * kw, cout, cin).astype(jnp.bfloat16))
        b_full = (jnp.repeat(self.bias, self.nto) if self.bias is not None
                  else jnp.zeros((cout,), jnp.float32))
        self._bias_col = b_full.reshape(cout, 1).astype(jnp.float32)

    def _transform_filter(self, w):
        # groupy trans_filter: index, permute to (out, nto, in, nti, k, k), view as
        # (out*nto, in*nti, k, k).  The pasted spec's (0,1,3,2,4,5) permute scrambles channel
        # groups; the canonical groupy order (0,2,1,3,4,5) is the one consistent with the
        # per-out_channel bias broadcast over nto (and is validated by the equivariance test).
        inds = self.inds
        nto, nti, k = inds.shape[0], inds.shape[1], inds.shape[2]
        ir = inds.reshape(-1, 3)
        w_indexed = w[:, :, ir[:, 0], ir[:, 1], ir[:, 2]]          # (out, in, nto*nti*k*k)
        w_indexed = w_indexed.reshape(w.shape[0], w.shape[1], nto, nti, k, k)
        w_t = jnp.transpose(w_indexed, (0, 2, 1, 3, 4, 5))         # (out, nto, in, nti, k, k)
        return w_t.reshape(self.out_channels * nto, self.in_channels * nti, k, k)

    def __call__(self, x):
        n = x.shape[0]
        h, w = x.shape[-2], x.shape[-1]
        x = x.reshape(n, self.cin, h, w)                  # matches the module's input reshape
        kh, kw = self.kernel_size
        ph, pw = self.padding
        y_flat, (ho, wo, wp, s_blk, n_pad) = pallas_gconv2d(
            x, self._w_taps, self._bias_col, kh=kh, kw=kw, ph=ph, pw=pw,
            out_dtype=self.out_dtype)
        # (N_pad, cout, s_blk): drop batch pad + garbage/alignment columns with narrow slices;
        # the trailing-dim reshape is free (no wrapper transposes).
        y = y_flat[:n, :, :ho * wp].reshape(n, self.cout, ho, wp)[:, :, :, :wo]
        sh, sw = self.stride
        if (sh, sw) != (1, 1):
            # TODO(synk): stride>1 computes the dense stride-1 output and subsamples; a strided
            # BlockSpec / pre-strided layout would avoid the wasted work.
            y = y[:, :, ::sh, ::sw]
        return y


# ---------------------------------------------------------------------------
# Pure-JAX reference (XLA conv) — same bf16 operands / f32 accumulation as the kernel.
# ---------------------------------------------------------------------------
def reference_forward(m, x):
    tw = m._transform_filter(m.weight).astype(jnp.bfloat16)
    n = x.shape[0]
    xr = x.reshape(n, m.cin, x.shape[-2], x.shape[-1]).astype(jnp.bfloat16)
    y = jax.lax.conv_general_dilated(
        xr, tw, window_strides=m.stride,
        padding=[(m.padding[0], m.padding[0]), (m.padding[1], m.padding[1])],
        dimension_numbers=("NCHW", "OIHW", "NCHW"),
        preferred_element_type=jnp.float32)
    if m.bias is not None:
        y = y + jnp.repeat(m.bias, m.nto).reshape(1, -1, 1, 1)
    return y


if __name__ == "__main__":
    key = jax.random.PRNGKey(0)
    k1, k2, kx = jax.random.split(key, 3)

    # Layer 1 (Z2 -> C4) feeds another gconv layer -> bf16 output (review #8); layer 2 keeps f32.
    layer1 = SplitGConv2dPallas("Z2", "C4", in_channels=4, out_channels=8,
                                kernel_size=3, stride=1, padding=1, bias=True,
                                key=k1, out_dtype=jnp.bfloat16)
    layer2 = SplitGConv2dPallas("C4", "C4", in_channels=8, out_channels=8,
                                kernel_size=3, stride=1, padding=1, bias=True,
                                key=k2, out_dtype=jnp.float32)

    x = jax.random.normal(kx, (2, 4, 16, 16), jnp.float32)   # NCHW, Z2 input

    y1 = jax.block_until_ready(layer1(x))
    y2 = jax.block_until_ready(layer2(y1))

    assert y1.shape == (2, 8 * 4, 16, 16), y1.shape
    assert y2.shape == (2, 8 * 4, 16, 16), y2.shape
    assert y1.dtype == jnp.bfloat16 and y2.dtype == jnp.float32

    # Numerical check vs an XLA conv reference with the same bf16 operands / f32 accumulation.
    # Layer-1 tolerance also covers the bf16 rounding of its output (<= ~1 bf16 ulp).
    r1 = reference_forward(layer1, x)
    r2 = reference_forward(layer2, y1)
    np.testing.assert_allclose(np.asarray(y1.astype(jnp.float32)), np.asarray(r1),
                               rtol=2e-2, atol=2e-2)
    np.testing.assert_allclose(np.asarray(y2), np.asarray(r2), rtol=1e-3, atol=1e-3)

    # Equivariance check (independent of reference_forward / _transform_filter sharing):
    # rotating the Z2 input must rotate the output spatially and cyclically shift the nto
    # group channels.  A scrambled filter transform would fail for every shift.
    y1r = jax.block_until_ready(layer1(jnp.rot90(x, k=1, axes=(-2, -1))))
    yg = np.asarray(y1.astype(jnp.float32)).reshape(2, 8, layer1.nto, 16, 16)
    ygr = np.asarray(y1r.astype(jnp.float32)).reshape(2, 8, layer1.nto, 16, 16)
    y_rot = np.rot90(yg, k=1, axes=(-2, -1))
    errs = [float(np.max(np.abs(ygr - np.roll(y_rot, shift=s, axis=2))))
            for s in range(layer1.nto)]
    assert min(errs) < 0.1, f"equivariance check failed, per-shift errors: {errs}"

    print("KERNEL_OK")
</pallas_src>

<mosaic_0001>
module attributes {stable_mosaic.version = 11 : i64} {
  func.func @_gconv2d_kernel(%arg0: i32, %arg1: memref<2x4x512xbf16, #tpu.memory_space<vmem>>, %arg2: memref<9x32x4xbf16, #tpu.memory_space<vmem>>, %arg3: memref<32x1xf32, #tpu.memory_space<vmem>>, %arg4: memref<2x32x384xbf16, #tpu.memory_space<vmem>>) attributes {dimension_semantics = [#tpu.dimension_semantics<parallel>], iteration_bounds = array<i64: 1>, scalar_prefetch = 0 : i64, scratch_operands = 0 : i64, tpu.core_type = #tpu.core_type<tc>, window_params = [{transform_indices = @transform_0, window_bounds = array<i64: 2, 4, 512>}, {pipeline_mode = #tpu.pipeline_mode<synchronous>, transform_indices = @transform_1, window_bounds = array<i64: 9, 32, 4>}, {pipeline_mode = #tpu.pipeline_mode<synchronous>, transform_indices = @transform_2, window_bounds = array<i64: 32, 1>}, {transform_indices = @transform_3, window_bounds = array<i64: 2, 32, 384>}]} {
    %c0 = arith.constant 0 : index
    %c0_0 = arith.constant 0 : index
    %0 = vector.load %arg3[%c0, %c0_0] : memref<32x1xf32, #tpu.memory_space<vmem>>, vector<32x1xf32>
    %c0_1 = arith.constant 0 : index
    %c0_2 = arith.constant 0 : index
    %c0_3 = arith.constant 0 : index
    %1 = vector.load %arg1[%c0_1, %c0_2, %c0_3] : memref<2x4x512xbf16, #tpu.memory_space<vmem>>, vector<1x4x512xbf16>
    %2 = vector.shape_cast %1 : vector<1x4x512xbf16> to vector<4x512xbf16>
    %c0_4 = arith.constant 0 : index
    %c0_5 = arith.constant 0 : index
    %c0_6 = arith.constant 0 : index
    %3 = vector.load %arg2[%c0_4, %c0_5, %c0_6] : memref<9x32x4xbf16, #tpu.memory_space<vmem>>, vector<1x32x4xbf16>
    %4 = vector.shape_cast %3 : vector<1x32x4xbf16> to vector<32x4xbf16>
    %5 = vector.extract_strided_slice %2 {offsets = [0, 0], sizes = [4, 384], strides = [1, 1]} : vector<4x512xbf16> to vector<4x384xbf16>
    %cst = arith.constant dense<0.000000e+00> : vector<32x384xf32>
    %6 = tpu.matmul %4, %5, %cst {dimension_numbers = #tpu.dot_dimension_numbers<[1], [0], [0], [1], [0, 0, 1, 1], [], []>} : vector<32x4xbf16>, vector<4x384xbf16>, vector<32x384xf32> -> vector<32x384xf32>
    %c1 = arith.constant 1 : index
    %c0_7 = arith.constant 0 : index
    %c0_8 = arith.constant 0 : index
    %7 = vector.load %arg2[%c1, %c0_7, %c0_8] : memref<9x32x4xbf16, #tpu.memory_space<vmem>>, vector<1x32x4xbf16>
    %8 = vector.shape_cast %7 : vector<1x32x4xbf16> to vector<32x4xbf16>
    %9 = vector.extract_strided_slice %2 {offsets = [0, 1], sizes = [4, 384], strides = [1, 1]} : vector<4x512xbf16> to vector<4x384xbf16>
    %cst_9 = arith.constant dense<0.000000e+00> : vector<32x384xf32>
    %10 = tpu.matmul %8, %9, %cst_9 {dimension_numbers = #tpu.dot_dimension_numbers<[1], [0], [0], [1], [0, 0, 1, 1], [], []>} : vector<32x4xbf16>, vector<4x384xbf16>, vector<32x384xf32> -> vector<32x384xf32>
    %11 = arith.addf %6, %10 : vector<32x384xf32>
    %c2 = arith.constant 2 : index
    %c0_10 = arith.constant 0 : index
    %c0_11 = arith.constant 0 : index
    %12 = vector.load %arg2[%c2, %c0_10, %c0_11] : memref<9x32x4xbf16, #tpu.memory_space<vmem>>, vector<1x32x4xbf16>
    %13 = vector.shape_cast %12 : vector<1x32x4xbf16> to vector<32x4xbf16>
    %14 = vector.extract_strided_slice %2 {offsets = [0, 2], sizes = [4, 384], strides = [1, 1]} : vector<4x512xbf16> to vector<4x384xbf16>
    %cst_12 = arith.constant dense<0.000000e+00> : vector<32x384xf32>
    %15 = tpu.matmul %13, %14, %cst_12 {dimension_numbers = #tpu.dot_dimension_numbers<[1], [0], [0], [1], [0, 0, 1, 1], [], []>} : vector<32x4xbf16>, vector<4x384xbf16>, vector<32x384xf32> -> vector<32x384xf32>
    %16 = arith.addf %11, %15 : vector<32x384xf32>
    %c3 = arith.constant 3 : index
    %c0_13 = arith.constant 0 : index
    %c0_14 = arith.constant 0 : index
    %17 = vector.load %arg2[%c3, %c0_13, %c0_14] : memref<9x32x4xbf16, #tpu.memory_space<vmem>>, vector<1x32x4xbf16>
    %18 = vector.shape_cast %17 : vector<1x32x4xbf16> to vector<32x4xbf16>
    %19 = vector.extract_strided_slice %2 {offsets = [0, 24], sizes = [4, 384], strides = [1, 1]} : vector<4x512xbf16> to vector<4x384xbf16>
    %cst_15 = arith.constant dense<0.000000e+00> : vector<32x384xf32>
    %20 = tpu.matmul %18, %19, %cst_15 {dimension_numbers = #tpu.dot_dimension_numbers<[1], [0], [0], [1], [0, 0, 1, 1], [], []>} : vector<32x4xbf16>, vector<4x384xbf16>, vector<32x384xf32> -> vector<32x384xf32>
    %21 = arith.addf %16, %20 : vector<32x384xf32>
    %c4 = arith.constant 4 : index
    %c0_16 = arith.constant 0 : index
    %c0_17 = arith.constant 0 : index
    %22 = vector.load %arg2[%c4, %c0_16, %c0_17] : memref<9x32x4xbf16, #tpu.memory_space<vmem>>, vector<1x32x4xbf16>
    %23 = vector.shape_cast %22 : vector<1x32x4xbf16> to vector<32x4xbf16>
    %24 = vector.extract_strided_slice %2 {offsets = [0, 25], sizes = [4, 384], strides = [1, 1]} : vector<4x512xbf16> to vector<4x384xbf16>
    %cst_18 = arith.constant dense<0.000000e+00> : vector<32x384xf32>
    %25 = tpu.matmul %23, %24, %cst_18 {dimension_numbers = #tpu.dot_dimension_numbers<[1], [0], [0], [1], [0, 0, 1, 1], [], []>} : vector<32x4xbf16>, vector<4x384xbf16>, vector<32x384xf32> -> vector<32x384xf32>
    %26 = arith.addf %21, %25 : vector<32x384xf32>
    %c5 = arith.constant 5 : index
    %c0_19 = arith.constant 0 : index
    %c0_20 = arith.constant 0 : index
    %27 = vector.load %arg2[%c5, %c0_19, %c0_20] : memref<9x32x4xbf16, #tpu.memory_space<vmem>>, vector<1x32x4xbf16>
    %28 = vector.shape_cast %27 : vector<1x32x4xbf16> to vector<32x4xbf16>
    %29 = vector.extract_strided_slice %2 {offsets = [0, 26], sizes = [4, 384], strides = [1, 1]} : vector<4x512xbf16> to vector<4x384xbf16>
    %cst_21 = arith.constant dense<0.000000e+00> : vector<32x384xf32>
    %30 = tpu.matmul %28, %29, %cst_21 {dimension_numbers = #tpu.dot_dimension_numbers<[1], [0], [0], [1], [0, 0, 1, 1], [], []>} : vector<32x4xbf16>, vector<4x384xbf16>, vector<32x384xf32> -> vector<32x384xf32>
    %31 = arith.addf %26, %30 : vector<32x384xf32>
    %c6 = arith.constant 6 : index
    %c0_22 = arith.constant 0 : index
    %c0_23 = arith.constant 0 : index
    %32 = vector.load %arg2[%c6, %c0_22, %c0_23] : memref<9x32x4xbf16, #tpu.memory_space<vmem>>, vector<1x32x4xbf16>
    %33 = vector.shape_cast %32 : vector<1x32x4xbf16> to vector<32x4xbf16>
    %34 = vector.extract_strided_slice %2 {offsets = [0, 48], sizes = [4, 384], strides = [1, 1]} : vector<4x512xbf16> to vector<4x384xbf16>
    %cst_24 = arith.constant dense<0.000000e+00> : vector<32x384xf32>
    %35 = tpu.matmul %33, %34, %cst_24 {dimension_numbers = #tpu.dot_dimension_numbers<[1], [0], [0], [1], [0, 0, 1, 1], [], []>} : vector<32x4xbf16>, vector<4x384xbf16>, vector<32x384xf32> -> vector<32x384xf32>
    %36 = arith.addf %31, %35 : vector<32x384xf32>
    %c7 = arith.constant 7 : index
    %c0_25 = arith.constant 0 : index
    %c0_26 = arith.constant 0 : index
    %37 = vector.load %arg2[%c7, %c0_25, %c0_26] : memref<9x32x4xbf16, #tpu.memory_space<vmem>>, vector<1x32x4xbf16>
    %38 = vector.shape_cast %37 : vector<1x32x4xbf16> to vector<32x4xbf16>
    %39 = vector.extract_strided_slice %2 {offsets = [0, 49], sizes = [4, 384], strides = [1, 1]} : vector<4x512xbf16> to vector<4x384xbf16>
    %cst_27 = arith.constant dense<0.000000e+00> : vector<32x384xf32>
    %40 = tpu.matmul %38, %39, %cst_27 {dimension_numbers = #tpu.dot_dimension_numbers<[1], [0], [0], [1], [0, 0, 1, 1], [], []>} : vector<32x4xbf16>, vector<4x384xbf16>, vector<32x384xf32> -> vector<32x384xf32>
    %41 = arith.addf %36, %40 : vector<32x384xf32>
    %c8 = arith.constant 8 : index
    %c0_28 = arith.constant 0 : index
    %c0_29 = arith.constant 0 : index
    %42 = vector.load %arg2[%c8, %c0_28, %c0_29] : memref<9x32x4xbf16, #tpu.memory_space<vmem>>, vector<1x32x4xbf16>
    %43 = vector.shape_cast %42 : vector<1x32x4xbf16> to vector<32x4xbf16>
    %44 = vector.extract_strided_slice %2 {offsets = [0, 50], sizes = [4, 384], strides = [1, 1]} : vector<4x512xbf16> to vector<4x384xbf16>
    %cst_30 = arith.constant dense<0.000000e+00> : vector<32x384xf32>
    %45 = tpu.matmul %43, %44, %cst_30 {dimension_numbers = #tpu.dot_dimension_numbers<[1], [0], [0], [1], [0, 0, 1, 1], [], []>} : vector<32x4xbf16>, vector<4x384xbf16>, vector<32x384xf32> -> vector<32x384xf32>
    %46 = arith.addf %41, %45 : vector<32x384xf32>
    %47 = vector.broadcast %0 : vector<32x1xf32> to vector<32x384xf32>
    %48 = arith.addf %46, %47 : vector<32x384xf32>
    %49 = arith.truncf %48 : vector<32x384xf32> to vector<32x384xbf16>
    %c0_31 = arith.constant 0 : index
    %c0_32 = arith.constant 0 : index
    %c0_33 = arith.constant 0 : index
    %50 = vector.load %arg4[%c0_31, %c0_32, %c0_33] : memref<2x32x384xbf16, #tpu.memory_space<vmem>>, vector<1x32x384xbf16>
    %51 = vector.shape_cast %50 : vector<1x32x384xbf16> to vector<32x384xbf16>
    %52 = vector.shape_cast %49 : vector<32x384xbf16> to vector<1x32x384xbf16>
    tpu.vector_store %arg4[%c0_31, %c0_32, %c0_33], %52 {strides = array<i32>} : memref<2x32x384xbf16, #tpu.memory_space<vmem>>, vector<1x32x384xbf16>,
    %c1_34 = arith.constant 1 : index
    %c0_35 = arith.constant 0 : index
    %c0_36 = arith.constant 0 : index
    %53 = vector.load %arg1[%c1_34, %c0_35, %c0_36] : memref<2x4x512xbf16, #tpu.memory_space<vmem>>, vector<1x4x512xbf16>
    %54 = vector.shape_cast %53 : vector<1x4x512xbf16> to vector<4x512xbf16>
    %c0_37 = arith.constant 0 : index
    %c0_38 = arith.constant 0 : index
    %c0_39 = arith.constant 0 : index
    %55 = vector.load %arg2[%c0_37, %c0_38, %c0_39] : memref<9x32x4xbf16, #tpu.memory_space<vmem>>, vector<1x32x4xbf16>
    %56 = vector.shape_cast %55 : vector<1x32x4xbf16> to vector<32x4xbf16>
    %57 = vector.extract_strided_slice %54 {offsets = [0, 0], sizes = [4, 384], strides = [1, 1]} : vector<4x512xbf16> to vector<4x384xbf16>
    %cst_40 = arith.constant dense<0.000000e+00> : vector<32x384xf32>
    %58 = tpu.matmul %56, %57, %cst_40 {dimension_numbers = #tpu.dot_dimension_numbers<[1], [0], [0], [1], [0, 0, 1, 1], [], []>} : vector<32x4xbf16>, vector<4x384xbf16>, vector<32x384xf32> -> vector<32x384xf32>
    %c1_41 = arith.constant 1 : index
    %c0_42 = arith.constant 0 : index
    %c0_43 = arith.constant 0 : index
    %59 = vector.load %arg2[%c1_41, %c0_42, %c0_43] : memref<9x32x4xbf16, #tpu.memory_space<vmem>>, vector<1x32x4xbf16>
    %60 = vector.shape_cast %59 : vector<1x32x4xbf16> to vector<32x4xbf16>
    %61 = vector.extract_strided_slice %54 {offsets = [0, 1], sizes = [4, 384], strides = [1, 1]} : vector<4x512xbf16> to vector<4x384xbf16>
    %cst_44 = arith.constant dense<0.000000e+00> : vector<32x384xf32>
    %62 = tpu.matmul %60, %61, %cst_44 {dimension_numbers = #tpu.dot_dimension_numbers<[1], [0], [0], [1], [0, 0, 1, 1], [], []>} : vector<32x4xbf16>, vector<4x384xbf16>, vector<32x384xf32> -> vector<32x384xf32>
    %63 = arith.addf %58, %62 : vector<32x384xf32>
    %c2_45 = arith.constant 2 : index
    %c0_46 = arith.constant 0 : index
    %c0_47 = arith.constant 0 : index
    %64 = vector.load %arg2[%c2_45, %c0_46, %c0_47] : memref<9x32x4xbf16, #tpu.memory_space<vmem>>, vector<1x32x4xbf16>
    %65 = vector.shape_cast %64 : vector<1x32x4xbf16> to vector<32x4xbf16>
    %66 = vector.extract_strided_slice %54 {offsets = [0, 2], sizes = [4, 384], strides = [1, 1]} : vector<4x512xbf16> to vector<4x384xbf16>
    %cst_48 = arith.constant dense<0.000000e+00> : vector<32x384xf32>
    %67 = tpu.matmul %65, %66, %cst_48 {dimension_numbers = #tpu.dot_dimension_numbers<[1], [0], [0], [1], [0, 0, 1, 1], [], []>} : vector<32x4xbf16>, vector<4x384xbf16>, vector<32x384xf32> -> vector<32x384xf32>
    %68 = arith.addf %63, %67 : vector<32x384xf32>
    %c3_49 = arith.constant 3 : index
    %c0_50 = arith.constant 0 : index
    %c0_51 = arith.constant 0 : index
    %69 = vector.load %arg2[%c3_49, %c0_50, %c0_51] : memref<9x32x4xbf16, #tpu.memory_space<vmem>>, vector<1x32x4xbf16>
    %70 = vector.shape_cast %69 : vector<1x32x4xbf16> to vector<32x4xbf16>
    %71 = vector.extract_strided_slice %54 {offsets = [0, 24], sizes = [4, 384], strides = [1, 1]} : vector<4x512xbf16> to vector<4x384xbf16>
    %cst_52 = arith.constant dense<0.000000e+00> : vector<32x384xf32>
    %72 = tpu.matmul %70, %71, %cst_52 {dimension_numbers = #tpu.dot_dimension_numbers<[1], [0], [0], [1], [0, 0, 1, 1], [], []>} : vector<32x4xbf16>, vector<4x384xbf16>, vector<32x384xf32> -> vector<32x384xf32>
    %73 = arith.addf %68, %72 : vector<32x384xf32>
    %c4_53 = arith.constant 4 : index
    %c0_54 = arith.constant 0 : index
    %c0_55 = arith.constant 0 : index
    %74 = vector.load %arg2[%c4_53, %c0_54, %c0_55] : memref<9x32x4xbf16, #tpu.memory_space<vmem>>, vector<1x32x4xbf16>
    %75 = vector.shape_cast %74 : vector<1x32x4xbf16> to vector<32x4xbf16>
    %76 = vector.extract_strided_slice %54 {offsets = [0, 25], sizes = [4, 384], strides = [1, 1]} : vector<4x512xbf16> to vector<4x384xbf16>
    %cst_56 = arith.constant dense<0.000000e+00> : vector<32x384xf32>
    %77 = tpu.matmul %75, %76, %cst_56 {dimension_numbers = #tpu.dot_dimension_numbers<[1], [0], [0], [1], [0, 0, 1, 1], [], []>} : vector<32x4xbf16>, vector<4x384xbf16>, vector<32x384xf32> -> vector<32x384xf32>
    %78 = arith.addf %73, %77 : vector<32x384xf32>
    %c5_57 = arith.constant 5 : index
    %c0_58 = arith.constant 0 : index
    %c0_59 = arith.constant 0 : index
    %79 = vector.load %arg2[%c5_57, %c0_58, %c0_59] : memref<9x32x4xbf16, #tpu.memory_space<vmem>>, vector<1x32x4xbf16>
    %80 = vector.shape_cast %79 : vector<1x32x4xbf16> to vector<32x4xbf16>
    %81 = vector.extract_strided_slice %54 {offsets = [0, 26], sizes = [4, 384], strides = [1, 1]} : vector<4x512xbf16> to vector<4x384xbf16>
    %cst_60 = arith.constant dense<0.000000e+00> : vector<32x384xf32>
    %82 = tpu.matmul %80, %81, %cst_60 {dimension_numbers = #tpu.dot_dimension_numbers<[1], [0], [0], [1], [0, 0, 1, 1], [], []>} : vector<32x4xbf16>, vector<4x384xbf16>, vector<32x384xf32> -> vector<32x384xf32>
    %83 = arith.addf %78, %82 : vector<32x384xf32>
    %c6_61 = arith.constant 6 : index
    %c0_62 = arith.constant 0 : index
    %c0_63 = arith.constant 0 : index
    %84 = vector.load %arg2[%c6_61, %c0_62, %c0_63] : memref<9x32x4xbf16, #tpu.memory_space<vmem>>, vector<1x32x4xbf16>
    %85 = vector.shape_cast %84 : vector<1x32x4xbf16> to vector<32x4xbf16>
    %86 = vector.extract_strided_slice %54 {offsets = [0, 48], sizes = [4, 384], strides = [1, 1]} : vector<4x512xbf16> to vector<4x384xbf16>
    %cst_64 = arith.constant dense<0.000000e+00> : vector<32x384xf32>
    %87 = tpu.matmul %85, %86, %cst_64 {dimension_numbers = #tpu.dot_dimension_numbers<[1], [0], [0], [1], [0, 0, 1, 1], [], []>} : vector<32x4xbf16>, vector<4x384xbf16>, vector<32x384xf32> -> vector<32x384xf32>
    %88 = arith.addf %83, %87 : vector<32x384xf32>
    %c7_65 = arith.constant 7 : index
    %c0_66 = arith.constant 0 : index
    %c0_67 = arith.constant 0 : index
    %89 = vector.load %arg2[%c7_65, %c0_66, %c0_67] : memref<9x32x4xbf16, #tpu.memory_space<vmem>>, vector<1x32x4xbf16>
    %90 = vector.shape_cast %89 : vector<1x32x4xbf16> to vector<32x4xbf16>
    %91 = vector.extract_strided_slice %54 {offsets = [0, 49], sizes = [4, 384], strides = [1, 1]} : vector<4x512xbf16> to vector<4x384xbf16>
    %cst_68 = arith.constant dense<0.000000e+00> : vector<32x384xf32>
    %92 = tpu.matmul %90, %91, %cst_68 {dimension_numbers = #tpu.dot_dimension_numbers<[1], [0], [0], [1], [0, 0, 1, 1], [], []>} : vector<32x4xbf16>, vector<4x384xbf16>, vector<32x384xf32> -> vector<32x384xf32>
    %93 = arith.addf %88, %92 : vector<32x384xf32>
    %c8_69 = arith.constant 8 : index
    %c0_70 = arith.constant 0 : index
    %c0_71 = arith.constant 0 : index
    %94 = vector.load %arg2[%c8_69, %c0_70, %c0_71] : memref<9x32x4xbf16, #tpu.memory_space<vmem>>, vector<1x32x4xbf16>
    %95 = vector.shape_cast %94 : vector<1x32x4xbf16> to vector<32x4xbf16>
    %96 = vector.extract_strided_slice %54 {offsets = [0, 50], sizes = [4, 384], strides = [1, 1]} : vector<4x512xbf16> to vector<4x384xbf16>
    %cst_72 = arith.constant dense<0.000000e+00> : vector<32x384xf32>
    %97 = tpu.matmul %95, %96, %cst_72 {dimension_numbers = #tpu.dot_dimension_numbers<[1], [0], [0], [1], [0, 0, 1, 1], [], []>} : vector<32x4xbf16>, vector<4x384xbf16>, vector<32x384xf32> -> vector<32x384xf32>
    %98 = arith.addf %93, %97 : vector<32x384xf32>
    %99 = vector.broadcast %0 : vector<32x1xf32> to vector<32x384xf32>
    %100 = arith.addf %98, %99 : vector<32x384xf32>
    %101 = arith.truncf %100 : vector<32x384xf32> to vector<32x384xbf16>
    %c1_73 = arith.constant 1 : index
    %c0_74 = arith.constant 0 : index
    %c0_75 = arith.constant 0 : index
    %102 = vector.load %arg4[%c1_73, %c0_74, %c0_75] : memref<2x32x384xbf16, #tpu.memory_space<vmem>>, vector<1x32x384xbf16>
    %103 = vector.shape_cast %102 : vector<1x32x384xbf16> to vector<32x384xbf16>
    %104 = vector.shape_cast %101 : vector<32x384xbf16> to vector<1x32x384xbf16>
    tpu.vector_store %arg4[%c1_73, %c0_74, %c0_75], %104 {strides = array<i32>} : memref<2x32x384xbf16, #tpu.memory_space<vmem>>, vector<1x32x384xbf16>,
    return
  }
  func.func @transform_0(%arg0: i32) -> (i32, i32, i32) {
    %c0_i32 = arith.constant 0 : i32
    %c0_i32_0 = arith.constant 0 : i32
    %c0_i32_1 = arith.constant 0 : i32
    return %arg0, %c0_i32, %c0_i32_0 : i32, i32, i32
  }
  func.func @transform_1(%arg0: i32) -> (i32, i32, i32) {
    %c0_i32 = arith.constant 0 : i32
    %c0_i32_0 = arith.constant 0 : i32
    %c0_i32_1 = arith.constant 0 : i32
    %c0_i32_2 = arith.constant 0 : i32
    return %c0_i32, %c0_i32_0, %c0_i32_1 : i32, i32, i32
  }
  func.func @transform_2(%arg0: i32) -> (i32, i32) {
    %c0_i32 = arith.constant 0 : i32
    %c0_i32_0 = arith.constant 0 : i32
    %c0_i32_1 = arith.constant 0 : i32
    return %c0_i32, %c0_i32_0 : i32, i32
  }
  func.func @transform_3(%arg0: i32) -> (i32, i32, i32) {
    %c0_i32 = arith.constant 0 : i32
    %c0_i32_0 = arith.constant 0 : i32
    %c0_i32_1 = arith.constant 0 : i32
    return %arg0, %c0_i32, %c0_i32_0 : i32, i32, i32
  }
}

</mosaic_0001>

<bundles_post_ra>
// kernel: tpu_custom_call.1
= control target key start
LH: loop header
LB: loop body
LE: loop exit
PB: predicated region body
PF: predicated region fallthrough
CT: control target
= control target key end

     0   :  { %v45_v1 = vlaneseq  ;;  %v3414_v2 = vmov 1983009808   ;;  %vm70_vm0 = vcmask 31744   ;;  %v3415_v8 = vmov 0   ;;  %s3416_s16 = smov 127   ;;  %s3417_s17 = smov 126   ;;  %s4370_s0 = inlined_call_operand.vmem [shape: bf16[2,4,512], index: 0, kind: input, shape index: {}]   ;;  %s4371_s1 = inlined_call_operand.vmem [shape: bf16[9,32,4], index: 1, kind: input, shape index: {}]   ;;  %s4372_s2 = inlined_call_operand.vmem [shape: f32[32,1], index: 2, kind: input, shape index: {}]   ;;  %s4373_s3 = inlined_call_operand.hbm [shape: bf16[2,32,384], index: 3, kind: output, shape index: {}]  }
   0x1   :  { %v20_v0 = vld [vmem:[%s4370_s0] sm:$0xff]  ;;  %v43_v3 = vunpack.c.l.s4 %v3414_v2  ;;  %v3453_v7 = vld [vmem:[%s4371_s1 + $0x10] sm:$0xff]   ;;  %119 = vmatprep.mubr.bf16.mxu0 %v3415_v8  ;;  %3353 = vset.pattern.permute.xlu1 %v3415_v8  ;;  %s3418_s18 = smov 104  }
   0x2   :  { %v46_v4 = vshrl.u32 %v45_v1, 7  ;;  %v41_v6 = vcombine.high %v20_v0, %v20_v0  ;;  %3215 = vmatprep.mubr.msk.bf16.mxu1 %vm70_vm0, %v3453_v7  ;;  %3352 = vset.pattern.permute.xlu0 %v3415_v8 }
   0x3   :  { %v44_v5 = vunpack.c.0.s8 %v43_v3 }
   0x5   :  { %v47_v9 = vsub.s32 %v44_v5, %v46_v4 }
   0x7   :  { %v3460_v10 = vrot.slane %v20_v0, %v47_v9  ;;  %v3462_v11 = vrot.slane %v41_v6, %v47_v9 }
   0x9   :  { %58 = vrot.lane.b32.xlu0 %v3460_v10, %s3416_s16  ;;  %62 = vrot.lane.b32.xlu1 %v3462_v11, %s3416_s16  ;;  %v3470_v12 = vcombine.high %v3460_v10, %v3460_v10  ;;  %v57_v13 = vcombine.high %v3462_v11, %v3462_v11 }
   0xd   :  { %60 = vrot.lane.b32.xlu0 %v3470_v12, %s3416_s16  ;;  %64 = vrot.lane.b32.xlu1 %v57_v13, %s3416_s16 }
  0x11   :  { %331 = vrot.lane.b32.xlu0 %v3460_v10, %s3417_s17  ;;  %333 = vrot.lane.b32.xlu1 %v3470_v12, %s3417_s17 }
  0x15   :  { %335 = vrot.lane.b32.xlu0 %v3462_v11, %s3417_s17  ;;  %337 = vrot.lane.b32.xlu1 %v57_v13, %s3417_s17 }
  0x19   :  { %487 = vrot.lane.b32.xlu0 %v3460_v10, %s3418_s18  ;;  %489 = vrot.lane.b32.xlu1 %v3470_v12, %s3418_s18 }
  0x1d   :  { %491 = vrot.lane.b32.xlu0 %v3462_v11, %s3418_s18  ;;  %493 = vrot.lane.b32.xlu1 %v57_v13, %s3418_s18 }
  0x1e   :  { %8 = vsyncpa [#allocation3], 0  ;;  %s3419_s19 = smov 103   ;;  %s3420_s20 = smov 102   ;;  %v3039_v14 = vld [vmem:[%s4370_s0 + $0x8] sm:$0xff]  ;;  %vm66_vm1 = vcmask 1039360  }
  0x1f   :  { %s3421_s21 = smov 80   ;;  %s3422_s22 = smov 79   ;;  %v1509_v15 = vcombine.high %v3039_v14, %v3039_v14  ;;  %v3526_v16 = vrot.slane %v3039_v14, %v47_v9  ;;  %vm77_vm2 = vcmask 1041408   ;;  %v3357_v29 = vld [vmem:[%s4371_s1 + $0x18] sm:$0xff]   ;;  %vm339_vm3 = vcmask 1031168   ;;  %v3358_v38 = vld [vmem:[%s4371_s1] sm:$0xff]  }
  0x20   :  { %s3423_s25 = smov 78   ;;  %v206_v31 = vsel %vm77_vm2, %v3460_v10, 0  ;;  %v212_v32 = vsel %vm77_vm2, %v3462_v11, 0  ;;  %vm495_vm4 = vcmask 850944   ;;  %v3359_v46 = vld [vmem:[%s4371_s1 + $0x8] sm:$0xff]   ;;  %v3360_v49 = vld [vmem:[%s4371_s1 + $0x20] sm:$0xff]  }
  0x21   :  { %643 = vrot.lane.b32.xlu0 %v3460_v10, %s3419_s19  ;;  %645 = vrot.lane.b32.xlu1 %v3470_v12, %s3419_s19  ;;  %v3533_v17 = vcombine.high %v3526_v16, %v3526_v16  ;;  %v3535_v18 = vrot.slane %v1509_v15, %v47_v9  ;;  %v3361_v54 = vld [vmem:[%s4371_s1 + $0x28] sm:$0xff]   ;;  %vm651_vm5 = vcmask 842752   ;;  %v3362_v61 = vld [vmem:[%s4371_s1 + $0x30] sm:$0xff]   ;;  %vm807_vm6 = vcmask 834560  }
  0x22   :  { %v17_v2 = vld [vmem:[%s4372_s2 + $0x8] sm:$0xff]  ;;  %v16_v4 = vld [vmem:[%s4372_s2] sm:$0xff]  ;;  %v18_v9 = vld [vmem:[%s4372_s2 + $0x10] sm:$0xff]  ;;  %vm963_vm7 = vcmask 654336   ;;  %vm1119_vm8 = vcmask 646144   ;;  %vm1275_vm9 = vcmask 637952  }
  0x23   :  { %v3543_v19 = vcombine.high %v3535_v18, %v3535_v18  ;;  %v19_v15 = vld [vmem:[%s4372_s2 + $0x18] sm:$0xff] }
  0x25   :  { %647 = vrot.lane.b32.xlu0 %v3462_v11, %s3419_s19  ;;  %649 = vrot.lane.b32.xlu1 %v57_v13, %s3419_s19 }
  0x29   :  { %799 = vrot.lane.b32.xlu0 %v3460_v10, %s3420_s20  ;;  %801 = vrot.lane.b32.xlu1 %v3470_v12, %s3420_s20 }
  0x2d   :  { %803 = vrot.lane.b32.xlu0 %v3462_v11, %s3420_s20  ;;  %805 = vrot.lane.b32.xlu1 %v57_v13, %s3420_s20 }
  0x31   :  { %955 = vrot.lane.b32.xlu0 %v3460_v10, %s3421_s21  ;;  %957 = vrot.lane.b32.xlu1 %v3470_v12, %s3421_s21 }
  0x35   :  { %959 = vrot.lane.b32.xlu0 %v3462_v11, %s3421_s21  ;;  %961 = vrot.lane.b32.xlu1 %v57_v13, %s3421_s21 }
  0x39   :  { %1111 = vrot.lane.b32.xlu0 %v3460_v10, %s3422_s22  ;;  %1113 = vrot.lane.b32.xlu1 %v3470_v12, %s3422_s22 }
  0x3d   :  { %1115 = vrot.lane.b32.xlu0 %v3462_v11, %s3422_s22  ;;  %1117 = vrot.lane.b32.xlu1 %v57_v13, %s3422_s22 }
  0x41   :  { %1267 = vrot.lane.b32.xlu0 %v3460_v10, %s3423_s25  ;;  %1269 = vrot.lane.b32.xlu1 %v3470_v12, %s3423_s25 }
  0x45   :  { %1271 = vrot.lane.b32.xlu0 %v3462_v11, %s3423_s25  ;;  %1273 = vrot.lane.b32.xlu1 %v57_v13, %s3423_s25 }
  0x49   :  { %1526 = vrot.lane.b32.xlu0 %v3526_v16, %s3416_s16  ;;  %1528 = vrot.lane.b32.xlu1 %v3533_v17, %s3416_s16 }
  0x4d   :  { %1530 = vrot.lane.b32.xlu0 %v3535_v18, %s3416_s16  ;;  %1532 = vrot.lane.b32.xlu1 %v3543_v19, %s3416_s16 }
  0x51   :  { %1795 = vrot.lane.b32.xlu0 %v3526_v16, %s3417_s17  ;;  %1797 = vrot.lane.b32.xlu1 %v3533_v17, %s3417_s17 }
  0x55   :  { %1799 = vrot.lane.b32.xlu0 %v3535_v18, %s3417_s17  ;;  %1801 = vrot.lane.b32.xlu1 %v3543_v19, %s3417_s17 }
  0x59   :  { %1949 = vrot.lane.b32.xlu0 %v3526_v16, %s3418_s18  ;;  %1951 = vrot.lane.b32.xlu1 %v3533_v17, %s3418_s18 }
  0x5d   :  { %1953 = vrot.lane.b32.xlu0 %v3535_v18, %s3418_s18  ;;  %1955 = vrot.lane.b32.xlu1 %v3543_v19, %s3418_s18 }
  0x61   :  { %2103 = vrot.lane.b32.xlu0 %v3526_v16, %s3419_s19  ;;  %2105 = vrot.lane.b32.xlu1 %v3533_v17, %s3419_s19 }
  0x65   :  { %2107 = vrot.lane.b32.xlu0 %v3535_v18, %s3419_s19  ;;  %2109 = vrot.lane.b32.xlu1 %v3543_v19, %s3419_s19 }
  0x69   :  { %2257 = vrot.lane.b32.xlu0 %v3526_v16, %s3420_s20  ;;  %2259 = vrot.lane.b32.xlu1 %v3533_v17, %s3420_s20 }
  0x6d   :  { %2261 = vrot.lane.b32.xlu0 %v3535_v18, %s3420_s20  ;;  %2263 = vrot.lane.b32.xlu1 %v3543_v19, %s3420_s20 }
  0x71   :  { %2411 = vrot.lane.b32.xlu0 %v3526_v16, %s3421_s21  ;;  %2413 = vrot.lane.b32.xlu1 %v3533_v17, %s3421_s21 }
  0x75   :  { %2415 = vrot.lane.b32.xlu0 %v3535_v18, %s3421_s21  ;;  %2417 = vrot.lane.b32.xlu1 %v3543_v19, %s3421_s21 }
  0x79   :  { %2565 = vrot.lane.b32.xlu0 %v3526_v16, %s3422_s22  ;;  %2567 = vrot.lane.b32.xlu1 %v3533_v17, %s3422_s22 }
  0x7b   :  { %v59_v20 = vpop.permute.xlu0 %58  ;;  %v63_v21 = vpop.permute.xlu1 %62 }
  0x7d   :  { %2569 = vrot.lane.b32.xlu0 %v3535_v18, %s3422_s22  ;;  %2571 = vrot.lane.b32.xlu1 %v3543_v19, %s3422_s22 }
  0x7f   :  { %v61_v22 = vpop.permute.xlu0 %60  ;;  %v65_v23 = vpop.permute.xlu1 %64 }
  0x80   :  { %v68_v24 = vsel %vm66_vm1, %v61_v22, %v63_v21  ;;  %v69_v25 = vsel %vm66_vm1, %v63_v21, %v65_v23  ;;  %v67_v26 = vsel %vm66_vm1, %v59_v20, %v61_v22  ;;  %v3365_v20 = vld [vmem:[%s4371_s1 + $0x48] sm:$0xff]  }
  0x81   :  { %2942 = vmatprep.subr.msk.bf16.mxu0 %vm77_vm2, %v68_v24  ;;  %3321 = vmatprep.subr.msk.bf16.mxu1 %vm77_vm2, %v69_v25  ;;  %v79_v27 = vsel %vm77_vm2, %v67_v26, 0  ;;  %v85_v28 = vsel %vm77_vm2, %v69_v25, 0 }
  0x82   :  { %102 = vmatpush1.bf16.msra.mxu0 %v79_v27  ;;  %3214 = vmatpush3.bf16.msra.mxu1 %v85_v28  ;;  %v3366_v27 = vld [vmem:[%s4371_s1 + $0x50] sm:$0xff]  }
  0x83   :  { %v332_v30 = vpop.permute.xlu0 %331  ;;  %3322 = vmatprep.subr.msk.bf16.mxu0 %vm77_vm2, %v3462_v11  ;;  %2949 = vmatprep.subr.msk.bf16.mxu1 %vm77_vm2, %v3470_v12  ;;  %v334_v33 = vpop.permute.xlu1 %333  ;;  %v3364_v11 = vld [vmem:[%s4371_s1 + $0x40] sm:$0xff]  }
  0x84   :  { %2719 = vrot.lane.b32.xlu0 %v3526_v16, %s3423_s25  ;;  %2721 = vrot.lane.b32.xlu1 %v3533_v17, %s3423_s25  ;;  %v340_v43 = vsel %vm339_vm3, %v332_v30, %v334_v33 }
  0x85   :  { %2943 = vmatmul.mubr.msk.bf16.vlgmr.msra.gmra.mxu0 %vm70_vm0, %v3453_v7  ;;  %3216 = vmatmul.mubr.msk.bf16.vlgmr.msra.gmra.mxu1 %vm70_vm0, %v3357_v29  ;;  %v350_v47 = vsel %vm77_vm2, %v340_v43, 0  ;;  %v3363_v7 = vld [vmem:[%s4371_s1 + $0x38] sm:$0xff]  }
  0x86   :  { %229 = vmatpush1.bf16.msra.mxu1 %v206_v31  ;;  %3220 = vmatpush3.bf16.msra.mxu0 %v212_v32 }
  0x87   :  { %v336_v34 = vpop.permute.xlu0 %335  ;;  %v338_v35 = vpop.permute.xlu1 %337  ;;  %129 = vmatprep.mubr.bf16.mxu0 %v3415_v8  ;;  %246 = vmatprep.mubr.bf16.mxu1 %v3415_v8 }
  0x88   :  { %v341_v36 = vsel %vm339_vm3, %v334_v33, %v336_v34  ;;  %v342_v37 = vsel %vm339_vm3, %v336_v34, %v338_v35  ;;  %2723 = vrot.lane.b32.xlu0 %v3535_v18, %s3423_s25  ;;  %2725 = vrot.lane.b32.xlu1 %v3543_v19, %s3423_s25  ;;  %v3367_v35 = vld [vmem:[%s4371_s1 + $0x58] sm:$0xff]  }
  0x89   :  { %2960 = vmatprep.subr.msk.bf16.mxu0 %vm77_vm2, %v341_v36  ;;  %3323 = vmatprep.subr.msk.bf16.mxu1 %vm77_vm2, %v342_v37  ;;  %v356_v39 = vsel %vm77_vm2, %v342_v37, 0  ;;  %v3368_v37 = vld [vmem:[%s4371_s1 + $0x60] sm:$0xff]  }
  0x8b   :  { %v488_v40 = vpop.permute.xlu0 %487  ;;  %v490_v41 = vpop.permute.xlu1 %489 }
  0x8c   :  { %v496_v53 = vsel %vm495_vm4, %v488_v40, %v490_v41  ;;  %1415 = vperm.xlu1 %3353, %v17_v2   ;;  %1410 = vperm.xlu0 %3352, %v16_v4   ;;  %v1677_v4 = vsel %vm77_vm2, %v3535_v18, 0 }
  0x8d   :  { %2944 = vmatmul.mubr.msk.bf16.gmra.mxu0 %vm70_vm0, %v3357_v29  ;;  %2950 = vmatmul.mubr.msk.bf16.vlgmr.msra.gmra.mxu1 %vm70_vm0, %v3358_v38  ;;  %v506_v56 = vsel %vm77_vm2, %v496_v53, 0 }
  0x8e   :  { %3226 = vmatpush3.bf16.msra.mxu1 %v356_v39  ;;  %256 = vmatprep.mubr.bf16.mxu1 %v3415_v8 }
  0x8f   :  { %3221 = vmatprep.mubr.msk.bf16.mxu0 %vm70_vm0, %v3358_v38  ;;  %v492_v42 = vpop.permute.xlu0 %491  ;;  %v494_v45 = vpop.permute.xlu1 %493 }
  0x90   :  { %v497_v44 = vsel %vm495_vm4, %v490_v41, %v492_v42  ;;  %v498_v50 = vsel %vm495_vm4, %v492_v42, %v494_v45  ;;  %1420 = vperm.xlu1 %3353, %v18_v9   ;;  %1425 = vperm.xlu0 %3352, %v19_v15   ;;  %v3369_v42 = vld [vmem:[%s4371_s1 + $0x68] sm:$0xff]   ;;  %v3376_v9 = vld [vmem:[%s4371_s1] sm:$0xff]  }
  0x91   :  { %2971 = vmatprep.subr.msk.bf16.mxu1 %vm77_vm2, %v497_v44  ;;  %v512_v57 = vsel %vm77_vm2, %v498_v50, 0 }
  0x93   :  { %v644_v48 = vpop.permute.xlu0 %643  ;;  %v646_v51 = vpop.permute.xlu1 %645 }
  0x94   :  { %v652_v5 = vsel %vm651_vm5, %v644_v48, %v646_v51 }
  0x95   :  { %2951 = vmatmul.mubr.msk.bf16.gmra.mxu1 %vm70_vm0, %v3359_v46  ;;  %3222 = vmatmul.mubr.msk.bf16.vlgmr.msra.gmra.mxu0 %vm70_vm0, %v3359_v46  ;;  %v662_v10 = vsel %vm77_vm2, %v652_v5, 0 }
  0x96   :  { %373 = vmatpush1.bf16.msra.mxu0 %v350_v47  ;;  %390 = vmatprep.mubr.bf16.mxu0 %v3415_v8 }
  0x97   :  { %3227 = vmatprep.mubr.msk.bf16.mxu1 %vm70_vm0, %v3360_v49  ;;  %3324 = vmatprep.subr.msk.bf16.mxu0 %vm77_vm2, %v498_v50  ;;  %v648_v52 = vpop.permute.xlu0 %647  ;;  %v650_v55 = vpop.permute.xlu1 %649 }
  0x98   :  { %v653_v59 = vsel %vm651_vm5, %v646_v51, %v648_v52  ;;  %v654_v60 = vsel %vm651_vm5, %v648_v52, %v650_v55  ;;  %v3371_v55 = vld [vmem:[%s4371_s1 + $0x78] sm:$0xff]  }
  0x99   :  { %v668_v0 = vsel %vm77_vm2, %v654_v60, 0 }
  0x9b   :  { %v800_v58 = vpop.permute.xlu0 %799  ;;  %v802_v63 = vpop.permute.xlu1 %801 }
  0x9c   :  { %v808_v19 = vsel %vm807_vm6, %v800_v58, %v802_v63  ;;  %v3372_v58 = vld [vmem:[%s4371_s1 + $0x80] sm:$0xff]  }
  0x9d   :  { %2961 = vmatmul.mubr.msk.bf16.vlgmr.msra.gmra.mxu0 %vm70_vm0, %v3360_v49  ;;  %3228 = vmatmul.mubr.msk.bf16.vlgmr.msra.gmra.mxu1 %vm70_vm0, %v3361_v54  ;;  %v818_v22 = vsel %vm77_vm2, %v808_v19, 0  ;;  %v3370_v49 = vld [vmem:[%s4371_s1 + $0x70] sm:$0xff]  }
  0x9e   :  { %529 = vmatpush1.bf16.msra.mxu1 %v506_v56  ;;  %3232 = vmatpush3.bf16.msra.mxu0 %v512_v57 }
  0x9f   :  { %2982 = vmatprep.subr.msk.bf16.mxu0 %vm77_vm2, %v653_v59  ;;  %400 = vmatprep.mubr.bf16.mxu0 %v3415_v8  ;;  %v804_v62 = vpop.permute.xlu0 %803  ;;  %v806_v6 = vpop.permute.xlu1 %805 }
  0xa0   :  { %546 = vmatprep.mubr.bf16.mxu1 %v3415_v8  ;;  %3325 = vmatprep.subr.msk.bf16.mxu1 %vm77_vm2, %v654_v60  ;;  %v809_v1 = vsel %vm807_vm6, %v802_v63, %v804_v62  ;;  %v810_v12 = vsel %vm807_vm6, %v804_v62, %v806_v6 }
  0xa1   :  { %v824_v23 = vsel %vm77_vm2, %v810_v12, 0 }
  0xa3   :  { %v956_v3 = vpop.permute.xlu0 %955  ;;  %v958_v13 = vpop.permute.xlu1 %957 }
  0xa4   :  { %v964_v33 = vsel %vm963_vm7, %v956_v3, %v958_v13 }
  0xa5   :  { %2962 = vmatmul.mubr.msk.bf16.gmra.mxu0 %vm70_vm0, %v3361_v54  ;;  %2972 = vmatmul.mubr.msk.bf16.vlgmr.msra.gmra.mxu1 %vm70_vm0, %v3362_v61  ;;  %v974_v36 = vsel %vm77_vm2, %v964_v33, 0  ;;  %v3380_v33 = vld [vmem:[%s4371_s1 + $0x30] sm:$0xff]  }
  0xa6   :  { %3238 = vmatpush3.bf16.msra.mxu1 %v668_v0  ;;  %556 = vmatprep.mubr.bf16.mxu1 %v3415_v8 }
  0xa7   :  { %3233 = vmatprep.mubr.msk.bf16.mxu0 %vm70_vm0, %v3362_v61  ;;  %2993 = vmatprep.subr.msk.bf16.mxu1 %vm77_vm2, %v809_v1  ;;  %v960_v14 = vpop.permute.xlu0 %959  ;;  %v962_v21 = vpop.permute.xlu1 %961  ;;  %v3373_v61 = vld [vmem:[%s4371_s1 + $0x88] sm:$0xff]   ;;  %v3374_v1 = vld [vmem:[%s4371_s1 + $0x10] sm:$0xff]  }
  0xa8   :  { %v965_v25 = vsel %vm963_vm7, %v958_v13, %v960_v14  ;;  %v966_v26 = vsel %vm963_vm7, %v960_v14, %v962_v21  ;;  %v3377_v13 = vld [vmem:[%s4371_s1 + $0x8] sm:$0xff]  }
  0xa9   :  { %v980_v30 = vsel %vm77_vm2, %v966_v26, 0 }
  0xab   :  { %v1112_v24 = vpop.permute.xlu0 %1111  ;;  %v1114_v29 = vpop.permute.xlu1 %1113 }
  0xac   :  { %v1120_v41 = vsel %vm1119_vm8, %v1112_v24, %v1114_v29 }
  0xad   :  { %2973 = vmatmul.mubr.msk.bf16.gmra.mxu1 %vm70_vm0, %v3363_v7  ;;  %3234 = vmatmul.mubr.msk.bf16.vlgmr.msra.gmra.mxu0 %vm70_vm0, %v3363_v7  ;;  %v1130_v44 = vsel %vm77_vm2, %v1120_v41, 0  ;;  %v3375_v7 = vld [vmem:[%s4371_s1 + $0x18] sm:$0xff]  }
  0xae   :  { %685 = vmatpush1.bf16.msra.mxu0 %v662_v10  ;;  %702 = vmatprep.mubr.bf16.mxu0 %v3415_v8 }
  0xaf   :  { %3239 = vmatprep.mubr.msk.bf16.mxu1 %vm70_vm0, %v3364_v11  ;;  %3326 = vmatprep.subr.msk.bf16.mxu0 %vm77_vm2, %v810_v12  ;;  %v1116_v28 = vpop.permute.xlu0 %1115  ;;  %v1118_v34 = vpop.permute.xlu1 %1117 }
  0xb0   :  { %v1121_v31 = vsel %vm1119_vm8, %v1114_v29, %v1116_v28  ;;  %v1122_v38 = vsel %vm1119_vm8, %v1116_v28, %v1118_v34 }
  0xb1   :  { %v1136_v45 = vsel %vm77_vm2, %v1122_v38, 0 }
  0xb3   :  { %v1268_v32 = vpop.permute.xlu0 %1267  ;;  %v1270_v39 = vpop.permute.xlu1 %1269 }
  0xb4   :  { %v1276_v54 = vsel %vm1275_vm9, %v1268_v32, %v1270_v39 }
  0xb5   :  { %2983 = vmatmul.mubr.msk.bf16.vlgmr.msra.gmra.mxu0 %vm70_vm0, %v3364_v11  ;;  %3240 = vmatmul.mubr.msk.bf16.vlgmr.msra.gmra.mxu1 %vm70_vm0, %v3365_v20  ;;  %v1286_v57 = vsel %vm77_vm2, %v1276_v54, 0 }
  0xb6   :  { %841 = vmatpush1.bf16.msra.mxu1 %v818_v22  ;;  %3244 = vmatpush3.bf16.msra.mxu0 %v824_v23  ;;  %v3378_v23 = vld [vmem:[%s4371_s1 + $0x20] sm:$0xff]  }
  0xb7   :  { %3004 = vmatprep.subr.msk.bf16.mxu0 %vm77_vm2, %v965_v25  ;;  %712 = vmatprep.mubr.bf16.mxu0 %v3415_v8  ;;  %v1272_v40 = vpop.permute.xlu0 %1271  ;;  %v1274_v43 = vpop.permute.xlu1 %1273 }
  0xb8   :  { %858 = vmatprep.mubr.bf16.mxu1 %v3415_v8  ;;  %3327 = vmatprep.subr.msk.bf16.mxu1 %vm77_vm2, %v966_v26  ;;  %v1277_v47 = vsel %vm1275_vm9, %v1270_v39, %v1272_v40  ;;  %v1278_v48 = vsel %vm1275_vm9, %v1272_v40, %v1274_v43 }
  0xb9   :  { %v1292_v52 = vsel %vm77_vm2, %v1278_v48, 0 }
  0xbb   :  { %v1527_v46 = vpop.permute.xlu0 %1526  ;;  %v1529_v51 = vpop.permute.xlu1 %1528 }
  0xbc   :  { %v1534_v60 = vsel %vm66_vm1, %v1527_v46, %v1529_v51 }
  0xbd   :  { %2984 = vmatmul.mubr.msk.bf16.gmra.mxu0 %vm70_vm0, %v3365_v20  ;;  %2994 = vmatmul.mubr.msk.bf16.vlgmr.msra.gmra.mxu1 %vm70_vm0, %v3366_v27  ;;  %v1544_v62 = vsel %vm77_vm2, %v1534_v60, 0  ;;  %v3385_v60 = vld [vmem:[%s4371_s1 + $0x58] sm:$0xff]  }
  0xbe   :  { %3250 = vmatpush3.bf16.msra.mxu1 %v980_v30  ;;  %868 = vmatprep.mubr.bf16.mxu1 %v3415_v8 }
  0xbf   :  { %3245 = vmatprep.mubr.msk.bf16.mxu0 %vm70_vm0, %v3366_v27  ;;  %3015 = vmatprep.subr.msk.bf16.mxu1 %vm77_vm2, %v1121_v31  ;;  %v1531_v50 = vpop.permute.xlu0 %1530  ;;  %v1533_v56 = vpop.permute.xlu1 %1532  ;;  %v3379_v31 = vld [vmem:[%s4371_s1 + $0x28] sm:$0xff]  }
  0xc0   :  { %v1535_v53 = vsel %vm66_vm1, %v1529_v51, %v1531_v50  ;;  %v1536_v59 = vsel %vm66_vm1, %v1531_v50, %v1533_v56 }
  0xc1   :  { %v1550_v63 = vsel %vm77_vm2, %v1536_v59, 0 }
  0xc3   :  { %v1796_v0 = vpop.permute.xlu0 %1795  ;;  %v1798_v3 = vpop.permute.xlu1 %1797 }
  0xc5   :  { %2995 = vmatmul.mubr.msk.bf16.gmra.mxu1 %vm70_vm0, %v3367_v35  ;;  %3246 = vmatmul.mubr.msk.bf16.vlgmr.msra.gmra.mxu0 %vm70_vm0, %v3367_v35 }
  0xc6   :  { %997 = vmatpush1.bf16.msra.mxu0 %v974_v36  ;;  %1014 = vmatprep.mubr.bf16.mxu0 %v3415_v8 }
  0xc7   :  { %3251 = vmatprep.mubr.msk.bf16.mxu1 %vm70_vm0, %v3368_v37  ;;  %3328 = vmatprep.subr.msk.bf16.mxu0 %vm77_vm2, %v1122_v38  ;;  %v1800_v2 = vpop.permute.xlu0 %1799  ;;  %v1802_v6 = vpop.permute.xlu1 %1801  ;;  %v3381_v38 = vld [vmem:[%s4371_s1 + $0x38] sm:$0xff]  }
  0xc8   :  { %v1804_v5 = vsel %vm339_vm3, %v1798_v3, %v1800_v2  ;;  %v1805_v10 = vsel %vm339_vm3, %v1800_v2, %v1802_v6 }
  0xc9   :  { %v1819_v19 = vsel %vm77_vm2, %v1805_v10, 0 }
  0xcb   :  { %v1952_v11 = vpop.permute.xlu1 %1951 }
  0xcd   :  { %3005 = vmatmul.mubr.msk.bf16.vlgmr.msra.gmra.mxu0 %vm70_vm0, %v3368_v37  ;;  %3252 = vmatmul.mubr.msk.bf16.vlgmr.msra.gmra.mxu1 %vm70_vm0, %v3369_v42 }
  0xce   :  { %1153 = vmatpush1.bf16.msra.mxu1 %v1130_v44  ;;  %3256 = vmatpush3.bf16.msra.mxu0 %v1136_v45  ;;  %v3382_v45 = vld [vmem:[%s4371_s1 + $0x40] sm:$0xff]  }
  0xcf   :  { %3026 = vmatprep.subr.msk.bf16.mxu0 %vm77_vm2, %v1277_v47  ;;  %1024 = vmatprep.mubr.bf16.mxu0 %v3415_v8  ;;  %v1956_v14 = vpop.permute.xlu1 %1955 }
  0xd0   :  { %1170 = vmatprep.mubr.bf16.mxu1 %v3415_v8  ;;  %3329 = vmatprep.subr.msk.bf16.mxu1 %vm77_vm2, %v1278_v48 }
  0xd3   :  { %v2106_v25 = vpop.permute.xlu1 %2105 }
  0xd5   :  { %3006 = vmatmul.mubr.msk.bf16.gmra.mxu0 %vm70_vm0, %v3369_v42  ;;  %3016 = vmatmul.mubr.msk.bf16.vlgmr.msra.gmra.mxu1 %vm70_vm0, %v3370_v49 }
  0xd6   :  { %3262 = vmatpush3.bf16.msra.mxu1 %v1292_v52  ;;  %1180 = vmatprep.mubr.bf16.mxu1 %v3415_v8 }
  0xd7   :  { %3257 = vmatprep.mubr.msk.bf16.mxu0 %vm70_vm0, %v3370_v49  ;;  %3046 = vmatprep.subr.msk.bf16.mxu1 %vm77_vm2, %v1535_v53  ;;  %v2110_v30 = vpop.permute.xlu1 %2109  ;;  %v3383_v53 = vld [vmem:[%s4371_s1 + $0x48] sm:$0xff]  }
  0xdb   :  { %v2260_v35 = vpop.permute.xlu1 %2259 }
  0xdd   :  { %3017 = vmatmul.mubr.msk.bf16.gmra.mxu1 %vm70_vm0, %v3371_v55  ;;  %3258 = vmatmul.mubr.msk.bf16.vlgmr.msra.gmra.mxu0 %vm70_vm0, %v3371_v55  ;;  %v3384_v55 = vld [vmem:[%s4371_s1 + $0x50] sm:$0xff]  }
  0xde   :  { %1309 = vmatpush1.bf16.msra.mxu0 %v1286_v57  ;;  %1326 = vmatprep.mubr.bf16.mxu0 %v3415_v8 }
  0xdf   :  { %3263 = vmatprep.mubr.msk.bf16.mxu1 %vm70_vm0, %v3372_v58  ;;  %3330 = vmatprep.subr.msk.bf16.mxu0 %vm77_vm2, %v1536_v59  ;;  %v2264_v39 = vpop.permute.xlu1 %2263 }
  0xe3   :  { %v2414_v47 = vpop.permute.xlu1 %2413 }
  0xe5   :  { %3027 = vmatmul.mubr.msk.bf16.vlgmr.msra.gmra.mxu0 %vm70_vm0, %v3372_v58  ;;  %3264 = vmatmul.mubr.msk.bf16.vlgmr.msra.gmra.mxu1 %vm70_vm0, %v3373_v61 }
  0xe6   :  { %1567 = vmatpush1.bf16.msra.mxu1 %v1544_v62  ;;  %3268 = vmatpush3.bf16.msra.mxu0 %v1550_v63 }
  0xe7   :  { %1336 = vmatprep.mubr.bf16.mxu0 %v3415_v8  ;;  %1584 = vmatprep.mubr.bf16.mxu1 %v3415_v8  ;;  %v2418_v52 = vpop.permute.xlu1 %2417 }
  0xe8   :  { %3331 = vmatprep.subr.msk.bf16.mxu1 %vm77_vm2, %v3535_v18  ;;  %3053 = vmatprep.subr.msk.bf16.mxu0 %vm77_vm2, %v3533_v17  ;;  %v1950_v17 = vpop.permute.xlu0 %1949  ;;  %v1671_v18 = vsel %vm77_vm2, %v3526_v16, 0  ;;  %v1803_v16 = vsel %vm339_vm3, %v1796_v0, %v1798_v3  ;;  %v3386_v3 = vld [vmem:[%s4371_s1 + $0x60] sm:$0xff]  }
  0xe9   :  { %v1813_v15 = vsel %vm77_vm2, %v1803_v16, 0  ;;  %v1957_v29 = vsel %vm495_vm4, %v1950_v17, %v1952_v11 }
  0xea   :  { %v1967_v32 = vsel %vm77_vm2, %v1957_v29, 0 }
  0xeb   :  { %v2568_v57 = vpop.permute.xlu1 %2567 }
  0xec   :  { %v1954_v12 = vpop.permute.xlu0 %1953 }
  0xed   :  { %3028 = vmatmul.mubr.msk.bf16.gmra.mxu0 %vm70_vm0, %v3373_v61  ;;  %3047 = vmatmul.mubr.msk.bf16.vlgmr.msra.gmra.mxu1 %vm70_vm0, %v3374_v1  ;;  %v1958_v21 = vsel %vm495_vm4, %v1952_v11, %v1954_v12  ;;  %v1959_v22 = vsel %vm495_vm4, %v1954_v12, %v1956_v14  ;;  %v3388_v11 = vld [vmem:[%s4371_s1 + $0x70] sm:$0xff]  }
  0xee   :  { %3274 = vmatpush3.bf16.msra.mxu1 %v1677_v4  ;;  %1594 = vmatprep.mubr.bf16.mxu1 %v3415_v8  ;;  %v1973_v26 = vsel %vm77_vm2, %v1959_v22, 0 }
  0xef   :  { %3269 = vmatprep.mubr.msk.bf16.mxu0 %vm70_vm0, %v3374_v1  ;;  %3064 = vmatprep.subr.msk.bf16.mxu1 %vm77_vm2, %v1804_v5  ;;  %v2572_v61 = vpop.permute.xlu1 %2571 }
  0xf0   :  { %v2104_v20 = vpop.permute.xlu0 %2103 }
  0xf1   :  { %v2111_v37 = vsel %vm651_vm5, %v2104_v20, %v2106_v25 }
  0xf2   :  { %v2121_v40 = vsel %vm77_vm2, %v2111_v37, 0 }
  0xf4   :  { %v2108_v24 = vpop.permute.xlu0 %2107 }
  0xf5   :  { %3048 = vmatmul.mubr.msk.bf16.gmra.mxu1 %vm70_vm0, %v3375_v7  ;;  %3270 = vmatmul.mubr.msk.bf16.vlgmr.msra.gmra.mxu0 %vm70_vm0, %v3375_v7  ;;  %v2112_v27 = vsel %vm651_vm5, %v2106_v25, %v2108_v24  ;;  %v2113_v34 = vsel %vm651_vm5, %v2108_v24, %v2110_v30  ;;  %v3390_v25 = vld [vmem:[%s4371_s1 + $0x80] sm:$0xff]  }
  0xf6   :  { %1694 = vmatpush1.bf16.msra.mxu0 %v1671_v18  ;;  %1711 = vmatprep.mubr.bf16.mxu0 %v3415_v8  ;;  %v2127_v41 = vsel %vm77_vm2, %v2113_v34, 0  ;;  %v2722_v5 = vpop.permute.xlu1 %2721  ;;  %v3387_v18 = vld [vmem:[%s4371_s1 + $0x68] sm:$0xff]  }
  0xf7   :  { %3275 = vmatprep.mubr.msk.bf16.mxu1 %vm70_vm0, %v3376_v9  ;;  %3332 = vmatprep.subr.msk.bf16.mxu0 %vm77_vm2, %v1805_v10 }
  0xf8   :  { %v2258_v28 = vpop.permute.xlu0 %2257 }
  0xf9   :  { %v2265_v51 = vsel %vm807_vm6, %v2258_v28, %v2260_v35 }
  0xfa   :  { %v2275_v54 = vsel %vm77_vm2, %v2265_v51, 0 }
  0xfc   :  { %v2262_v36 = vpop.permute.xlu0 %2261 }
  0xfd   :  { %3054 = vmatmul.mubr.msk.bf16.vlgmr.msra.gmra.mxu0 %vm70_vm0, %v3376_v9  ;;  %3276 = vmatmul.mubr.msk.bf16.vlgmr.msra.gmra.mxu1 %vm70_vm0, %v3377_v13  ;;  %v2266_v43 = vsel %vm807_vm6, %v2260_v35, %v2262_v36  ;;  %v2267_v44 = vsel %vm807_vm6, %v2262_v36, %v2264_v39  ;;  %v2726_v9 = vpop.permute.xlu1 %2725  ;;  %v3391_v36 = vld [vmem:[%s4371_s1 + $0x88] sm:$0xff]  }
  0xfe   :  { %1836 = vmatpush1.bf16.msra.mxu1 %v1813_v15  ;;  %3280 = vmatpush3.bf16.msra.mxu0 %v1819_v19  ;;  %v2281_v48 = vsel %vm77_vm2, %v2267_v44, 0 }
  0xff   :  { %3075 = vmatprep.subr.msk.bf16.mxu0 %vm77_vm2, %v1958_v21  ;;  %1721 = vmatprep.mubr.bf16.mxu0 %v3415_v8 }
 0x100   :  { %1853 = vmatprep.mubr.bf16.mxu1 %v3415_v8  ;;  %3333 = vmatprep.subr.msk.bf16.mxu1 %vm77_vm2, %v1959_v22  ;;  %v2412_v42 = vpop.permute.xlu0 %2411 }
 0x101   :  { %v2419_v59 = vsel %vm963_vm7, %v2412_v42, %v2414_v47 }
 0x102   :  { %v2429_v62 = vsel %vm77_vm2, %v2419_v59, 0 }
 0x104   :  { %v2416_v46 = vpop.permute.xlu0 %2415 }
 0x105   :  { %3055 = vmatmul.mubr.msk.bf16.gmra.mxu0 %vm70_vm0, %v3377_v13  ;;  %3065 = vmatmul.mubr.msk.bf16.vlgmr.msra.gmra.mxu1 %vm70_vm0, %v3378_v23  ;;  %v2420_v49 = vsel %vm963_vm7, %v2414_v47, %v2416_v46  ;;  %v2421_v56 = vsel %vm963_vm7, %v2416_v46, %v2418_v52  ;;  %v3389_v13 = vld [vmem:[%s4371_s1 + $0x78] sm:$0xff]   ;;  %s3424_s1 = smov [#allocation2]  }
 0x106   :  { %3286 = vmatpush3.bf16.msra.mxu1 %v1973_v26  ;;  %1863 = vmatprep.mubr.bf16.mxu1 %v3415_v8  ;;  %v2435_v63 = vsel %vm77_vm2, %v2421_v56, 0  ;;  %s2925_s18 = sshll.u32 %s3424_s1, 4  ;;  %s2926_s18 = int_to_ptr.vmem [resolvable:$true] %s2925_s18 }
 0x107   :  { %3281 = vmatprep.mubr.msk.bf16.mxu0 %vm70_vm0, %v3378_v23  ;;  %3086 = vmatprep.subr.msk.bf16.mxu1 %vm77_vm2, %v2112_v27  ;;  %s3392_s19 = scalar_lea.vmem %s2926_s18, 1536  ;;  %p3397_p1 = scmp.lt.s32.totalorder %s2926_s18, %s2926_s18 }
 0x108   :  { %v2566_v50 = vpop.permute.xlu0 %2565  ;;  %p3393_p0 = scmp.ne.s32.totalorder %s2926_s18, %s3392_s19  ;;  %p3398_p2 = scmp.lt.s32.totalorder %s3392_s19, %s3392_s19 }
 0x109   :  { %v2573_v7 = vsel %vm1119_vm8, %v2566_v50, %v2568_v57 }
 0x10a   :  { %v2583_v10 = vsel %vm77_vm2, %v2573_v7, 0  ;;  %p3399_p3 = por %p3398_p2, %p3397_p1 }
 0x10c   :  { %v2570_v58 = vpop.permute.xlu0 %2569  ;;  %p3400_p4 = pnand %p3399_p3, %p3393_p0 }
 0x10d   :  { %3066 = vmatmul.mubr.msk.bf16.gmra.mxu1 %vm70_vm0, %v3379_v31  ;;  %3282 = vmatmul.mubr.msk.bf16.vlgmr.msra.gmra.mxu0 %vm70_vm0, %v3379_v31  ;;  %v2574_v1 = vsel %vm1119_vm8, %v2568_v57, %v2570_v58  ;;  %v2575_v2 = vsel %vm1119_vm8, %v2570_v58, %v2572_v61 }
 0x10e   :  { %1990 = vmatpush1.bf16.msra.mxu0 %v1967_v32  ;;  %2007 = vmatprep.mubr.bf16.mxu0 %v3415_v8  ;;  %v2589_v17 = vsel %vm77_vm2, %v2575_v2, 0 }
 0x10f   :  { %3287 = vmatprep.mubr.msk.bf16.mxu1 %vm70_vm0, %v3380_v33  ;;  %3334 = vmatprep.subr.msk.bf16.mxu0 %vm77_vm2, %v2113_v34 }
 0x110   :  { %v2720_v0 = vpop.permute.xlu0 %2719 }
 0x111   :  { %v2727_v16 = vsel %vm1275_vm9, %v2720_v0, %v2722_v5 }
 0x112   :  { %v2737_v14 = vsel %vm77_vm2, %v2727_v16, 0 }
 0x114   :  { %v2724_v4 = vpop.permute.xlu0 %2723 }
 0x115   :  { %3076 = vmatmul.mubr.msk.bf16.vlgmr.msra.gmra.mxu0 %vm70_vm0, %v3380_v33  ;;  %3288 = vmatmul.mubr.msk.bf16.vlgmr.msra.gmra.mxu1 %vm70_vm0, %v3381_v38  ;;  %v2728_v6 = vsel %vm1275_vm9, %v2722_v5, %v2724_v4  ;;  %v2729_v12 = vsel %vm1275_vm9, %v2724_v4, %v2726_v9 }
 0x116   :  { %2144 = vmatpush1.bf16.msra.mxu1 %v2121_v40  ;;  %3292 = vmatpush3.bf16.msra.mxu0 %v2127_v41  ;;  %v2743_v15 = vsel %vm77_vm2, %v2729_v12, 0 }
 0x117   :  { %3097 = vmatprep.subr.msk.bf16.mxu0 %vm77_vm2, %v2266_v43  ;;  %2017 = vmatprep.mubr.bf16.mxu0 %v3415_v8 }
 0x118   :  { %2161 = vmatprep.mubr.bf16.mxu1 %v3415_v8  ;;  %3335 = vmatprep.subr.msk.bf16.mxu1 %vm77_vm2, %v2267_v44 }
 0x11d   :  { %3077 = vmatmul.mubr.msk.bf16.gmra.mxu0 %vm70_vm0, %v3381_v38  ;;  %3087 = vmatmul.mubr.msk.bf16.vlgmr.msra.gmra.mxu1 %vm70_vm0, %v3382_v45 }
 0x11e   :  { %3298 = vmatpush3.bf16.msra.mxu1 %v2281_v48  ;;  %2171 = vmatprep.mubr.bf16.mxu1 %v3415_v8 }
 0x11f   :  { %3293 = vmatprep.mubr.msk.bf16.mxu0 %vm70_vm0, %v3382_v45  ;;  %3108 = vmatprep.subr.msk.bf16.mxu1 %vm77_vm2, %v2420_v49 }
 0x125   :  { %3088 = vmatmul.mubr.msk.bf16.gmra.mxu1 %vm70_vm0, %v3383_v53  ;;  %3294 = vmatmul.mubr.msk.bf16.vlgmr.msra.gmra.mxu0 %vm70_vm0, %v3383_v53 }
 0x126   :  { %2298 = vmatpush1.bf16.msra.mxu0 %v2275_v54  ;;  %2315 = vmatprep.mubr.bf16.mxu0 %v3415_v8 }
 0x127   :  { %3299 = vmatprep.mubr.msk.bf16.mxu1 %vm70_vm0, %v3384_v55  ;;  %3336 = vmatprep.subr.msk.bf16.mxu0 %vm77_vm2, %v2421_v56 }
 0x12d   :  { %3098 = vmatmul.mubr.msk.bf16.vlgmr.msra.gmra.mxu0 %vm70_vm0, %v3384_v55  ;;  %3300 = vmatmul.mubr.msk.bf16.vlgmr.msra.gmra.mxu1 %vm70_vm0, %v3385_v60 }
 0x12e   :  { %2452 = vmatpush1.bf16.msra.mxu1 %v2429_v62  ;;  %3304 = vmatpush3.bf16.msra.mxu0 %v2435_v63 }
 0x12f   :  { %3119 = vmatprep.subr.msk.bf16.mxu0 %vm77_vm2, %v2574_v1  ;;  %2325 = vmatprep.mubr.bf16.mxu0 %v3415_v8 }
 0x130   :  { %2469 = vmatprep.mubr.bf16.mxu1 %v3415_v8  ;;  %3337 = vmatprep.subr.msk.bf16.mxu1 %vm77_vm2, %v2575_v2 }
 0x135   :  { %3099 = vmatmul.mubr.msk.bf16.gmra.mxu0 %vm70_vm0, %v3385_v60  ;;  %3109 = vmatmul.mubr.msk.bf16.vlgmr.msra.gmra.mxu1 %vm70_vm0, %v3386_v3 }
 0x136   :  { %3310 = vmatpush3.bf16.msra.mxu1 %v2589_v17  ;;  %2479 = vmatprep.mubr.bf16.mxu1 %v3415_v8 }
 0x137   :  { %3305 = vmatprep.mubr.msk.bf16.mxu0 %vm70_vm0, %v3386_v3  ;;  %3130 = vmatprep.subr.msk.bf16.mxu1 %vm77_vm2, %v2728_v6 }
 0x13d   :  { %3110 = vmatmul.mubr.msk.bf16.gmra.mxu1 %vm70_vm0, %v3387_v18  ;;  %3306 = vmatmul.mubr.msk.bf16.vlgmr.msra.gmra.mxu0 %vm70_vm0, %v3387_v18 }
 0x13e   :  { %2606 = vmatpush1.bf16.msra.mxu0 %v2583_v10  ;;  %2623 = vmatprep.mubr.bf16.mxu0 %v3415_v8 }
 0x13f   :  { %3311 = vmatprep.mubr.msk.bf16.mxu1 %vm70_vm0, %v3388_v11  ;;  %3338 = vmatprep.subr.msk.bf16.mxu0 %vm77_vm2, %v2729_v12 }
 0x145   :  { %v121_v19 = vpop.f32.mrf.mxu0  ;;  %v3217_v20 = vpop.f32.mrf.mxu1  ;;  %3120 = vmatmul.mubr.msk.bf16.vlgmr.msra.gmra.mxu0 %vm70_vm0, %v3388_v11  ;;  %3312 = vmatmul.mubr.msk.bf16.vlgmr.msra.gmra.mxu1 %vm70_vm0, %v3389_v13 }
 0x146   :  { %2760 = vmatpush1.bf16.msra.mxu1 %v2737_v14  ;;  %3316 = vmatpush3.bf16.msra.mxu0 %v2743_v15 }
 0x147   :  { %v123_v21 = vpop.f32.mrf.mxu0  ;;  %v174_v22 = vpop.f32.mrf.mxu1  ;;  %2633 = vmatprep.mubr.bf16.mxu0 %v3415_v8  ;;  %2777 = vmatprep.mubr.bf16.mxu1 %v3415_v8 }
 0x149   :  { %v125_v23 = vpop.f32.mrf.mxu0  ;;  %v3218_v24 = vpop.f32.mrf.mxu1 }
 0x14b   :  { %v127_v26 = vpop.f32.mrf.mxu0  ;;  %v177_v27 = vpop.f32.mrf.mxu1 }
 0x14d   :  { %v131_v28 = vpop.f32.mrf.mxu0  ;;  %v248_v29 = vpop.f32.mrf.mxu1  ;;  %3121 = vmatmul.mubr.msk.bf16.gmra.mxu0 %vm70_vm0, %v3389_v13  ;;  %3131 = vmatmul.mubr.msk.bf16.vlgmr.msra.gmra.mxu1 %vm70_vm0, %v3390_v25 }
 0x14e   :  { %v3950_v30 = vadd.f32 %v248_v29, %v121_v19  ;;  %2787 = vmatprep.mubr.bf16.mxu1 %v3415_v8  ;;  %3317 = vmatprep.mubr.msk.bf16.mxu0 %vm70_vm0, %v3390_v25 }
 0x14f   :  { %v133_v31 = vpop.f32.mrf.mxu0  ;;  %v250_v32 = vpop.f32.mrf.mxu1 }
 0x150   :  { %v3954_v33 = vadd.f32 %v250_v32, %v123_v21 }
 0x151   :  { %v135_v34 = vpop.f32.mrf.mxu0  ;;  %v252_v35 = vpop.f32.mrf.mxu1 }
 0x152   :  { %v3959_v37 = vadd.f32 %v252_v35, %v125_v23 }
 0x153   :  { %v137_v38 = vpop.f32.mrf.mxu0  ;;  %v254_v39 = vpop.f32.mrf.mxu1 }
 0x154   :  { %v3961_v40 = vadd.f32 %v254_v39, %v127_v26 }
 0x155   :  { %v258_v41 = vpop.f32.mrf.mxu1  ;;  %v3223_v8 = vpop.f32.mrf.mxu0  ;;  %3132 = vmatmul.mubr.msk.bf16.gmra.mxu1 %vm70_vm0, %v3391_v36  ;;  %3318 = vmatmul.mubr.msk.bf16.vlgmr.msra.gmra.mxu0 %vm70_vm0, %v3391_v36 }
 0x156   :  { %v3965_v42 = vadd.f32 %v258_v41, %v131_v28  ;;  %v3967_v43 = vadd.f32 %v3223_v8, %v3217_v20 }
 0x157   :  { %v260_v44 = vpop.f32.mrf.mxu1  ;;  %v301_v45 = vpop.f32.mrf.mxu0 }
 0x158   :  { %v3969_v46 = vadd.f32 %v260_v44, %v133_v31  ;;  %v3971_v47 = vadd.f32 %v301_v45, %v174_v22 }
 0x159   :  { %v262_v48 = vpop.f32.mrf.mxu1  ;;  %v3224_v49 = vpop.f32.mrf.mxu0 }
 0x15a   :  { %v3973_v50 = vadd.f32 %v262_v48, %v135_v34  ;;  %v3975_v51 = vadd.f32 %v3224_v49, %v3218_v24 }
 0x15b   :  { %v264_v52 = vpop.f32.mrf.mxu1  ;;  %v304_v53 = vpop.f32.mrf.mxu0 }
 0x15c   :  { %v3977_v54 = vadd.f32 %v264_v52, %v137_v38  ;;  %v3979_v55 = vadd.f32 %v304_v53, %v177_v27 }
 0x15d   :  { %v392_v56 = vpop.f32.mrf.mxu0  ;;  %v3229_v57 = vpop.f32.mrf.mxu1 }
 0x15f   :  { %v394_v58 = vpop.f32.mrf.mxu0  ;;  %v445_v59 = vpop.f32.mrf.mxu1 }
 0x161   :  { %v396_v60 = vpop.f32.mrf.mxu0  ;;  %v3230_v61 = vpop.f32.mrf.mxu1 }
 0x163   :  { %v398_v62 = vpop.f32.mrf.mxu0  ;;  %v448_v63 = vpop.f32.mrf.mxu1 }
 0x165   :  { %v402_v0 = vpop.f32.mrf.mxu0  ;;  %v548_v1 = vpop.f32.mrf.mxu1 }
 0x167   :  { %v404_v2 = vpop.f32.mrf.mxu0  ;;  %v550_v3 = vpop.f32.mrf.mxu1 }
 0x169   :  { %v3981_v4 = vpop.f32.mrf.mxu0  ;;  %v3983_v5 = vpop.f32.mrf.mxu1 }
 0x16b   :  { %v3985_v17 = vpop.f32.mrf.mxu0  ;;  %v3987_v6 = vpop.f32.mrf.mxu1 }
 0x16d   :  { %v3989_v7 = vpop.f32.mrf.mxu1  ;;  %v3235_v18 = vpop.f32.mrf.mxu0 }
 0x16f   :  { %v3991_v9 = vpop.f32.mrf.mxu1  ;;  %v3993_v10 = vpop.f32.mrf.mxu0 }
 0x171   :  { %v3995_v11 = vpop.f32.mrf.mxu1  ;;  %v3997_v12 = vpop.f32.mrf.mxu0 }
 0x173   :  { %v3999_v16 = vpop.f32.mrf.mxu1  ;;  %v4001_v13 = vpop.f32.mrf.mxu0 }
 0x175   :  { %v4003_v14 = vpop.f32.mrf.mxu0  ;;  %v4005_v15 = vpop.f32.mrf.mxu1 }
 0x177   :  { %v4007_v19 = vpop.f32.mrf.mxu0  ;;  %v4009_v20 = vpop.f32.mrf.mxu1 }
 0x179   :  { %v4011_v21 = vpop.f32.mrf.mxu0  ;;  %v4013_v22 = vpop.f32.mrf.mxu1 }
 0x17b   :  { %v4015_v23 = vpop.f32.mrf.mxu0  ;;  %v4017_v24 = vpop.f32.mrf.mxu1 }
 0x17d   :  { %v4019_v25 = vpop.f32.mrf.mxu0  ;;  %v4021_v26 = vpop.f32.mrf.mxu1 }
 0x17f   :  { %v4023_v27 = vpop.f32.mrf.mxu0  ;;  %v4025_v28 = vpop.f32.mrf.mxu1 }
 0x181   :  { %v4027_v29 = vpop.f32.mrf.mxu0  ;;  %v4029_v31 = vpop.f32.mrf.mxu1 }
 0x182   :  { %4382 = vst [vmem:[#allocation5_spill] sm:$0xff] %v4029_v31  ;;  %v460_v31 = vadd.f32 %v392_v56, %v3950_v30  ;;  %v466_v30 = vadd.f32 %v402_v0, %v3965_v42  ;;  %v4100_v0 = vpop.permute.xlu1 %1415 }
 0x183   :  { %v4031_v32 = vpop.f32.mrf.mxu0  ;;  %v4033_v34 = vpop.f32.mrf.mxu1  ;;  %4400 = vst [vmem:[#allocation23_spill] sm:$0xff] %v4100_v0 }
 0x184   :  { %4383 = vst [vmem:[#allocation6_spill] sm:$0xff] %v4031_v32  ;;  %4384 = vst [vmem:[#allocation7_spill] sm:$0xff] %v4033_v34  ;;  %v616_v56 = vadd.f32 %v548_v1, %v460_v31  ;;  %v622_v42 = vadd.f32 %v3989_v7, %v466_v30 }
 0x185   :  { %v4035_v35 = vpop.f32.mrf.mxu1  ;;  %v3247_v36 = vpop.f32.mrf.mxu0 }
 0x186   :  { %4385 = vst [vmem:[#allocation8_spill] sm:$0xff] %v4035_v35 }
 0x187   :  { %v4037_v38 = vpop.f32.mrf.mxu1  ;;  %v4039_v39 = vpop.f32.mrf.mxu0 }
 0x188   :  { %4386 = vst [vmem:[#allocation9_spill] sm:$0xff] %v4037_v38 }
 0x189   :  { %v4041_v41 = vpop.f32.mrf.mxu1  ;;  %v4043_v8 = vpop.f32.mrf.mxu0 }
 0x18a   :  { %4387 = vst [vmem:[#allocation10_spill] sm:$0xff] %v4041_v41  ;;  %4388 = vst [vmem:[#allocation11_spill] sm:$0xff] %v4043_v8 }
 0x18b   :  { %v4045_v44 = vpop.f32.mrf.mxu1  ;;  %v4047_v45 = vpop.f32.mrf.mxu0 }
 0x18c   :  { %4389 = vst [vmem:[#allocation12_spill] sm:$0xff] %v4045_v44  ;;  %4390 = vst [vmem:[#allocation13_spill] sm:$0xff] %v4047_v45 }
 0x18d   :  { %v1016_v48 = vpop.f32.mrf.mxu0  ;;  %v3253_v49 = vpop.f32.mrf.mxu1 }
 0x18f   :  { %v4049_v52 = vpop.f32.mrf.mxu0  ;;  %v4051_v53 = vpop.f32.mrf.mxu1 }
 0x190   :  { %4391 = vst [vmem:[#allocation14_spill] sm:$0xff] %v4049_v52  ;;  %4392 = vst [vmem:[#allocation15_spill] sm:$0xff] %v4051_v53  ;;  %v468_v52 = vadd.f32 %v3229_v57, %v3967_v43  ;;  %v461_v53 = vadd.f32 %v394_v58, %v3954_v33  ;;  %v467_v43 = vadd.f32 %v404_v2, %v3969_v46 }
 0x191   :  { %v4053_v35 = vpop.f32.mrf.mxu0  ;;  %v4055_v34 = vpop.f32.mrf.mxu1  ;;  %v469_v58 = vadd.f32 %v3981_v4, %v3973_v50 }
 0x192   :  { %4393 = vst [vmem:[#allocation16_spill] sm:$0xff] %v4053_v35  ;;  %4394 = vst [vmem:[#allocation17_spill] sm:$0xff] %v4055_v34  ;;  %v462_v35 = vadd.f32 %v445_v59, %v3971_v47  ;;  %v617_v33 = vadd.f32 %v550_v3, %v461_v53  ;;  %v623_v46 = vadd.f32 %v3991_v9, %v467_v43  ;;  %v4409_v53 = vld [vmem:[#allocation11_spill] sm:$0xff] }
 0x193   :  { %v4057_v38 = vpop.f32.mrf.mxu0  ;;  %v4059_v32 = vpop.f32.mrf.mxu1 }
 0x194   :  { %4395 = vst [vmem:[#allocation18_spill] sm:$0xff] %v4057_v38  ;;  %4396 = vst [vmem:[#allocation19_spill] sm:$0xff] %v4059_v32  ;;  %v463_v32 = vadd.f32 %v396_v60, %v3959_v37  ;;  %v618_v59 = vadd.f32 %v3993_v10, %v462_v35  ;;  %v773_v3 = vadd.f32 %v4007_v19, %v617_v33 }
 0x195   :  { %v4061_v41 = vpop.f32.mrf.mxu0  ;;  %v1172_v8 = vpop.f32.mrf.mxu1 }
 0x196   :  { %4397 = vst [vmem:[#allocation20_spill] sm:$0xff] %v4061_v41  ;;  %v471_v41 = vadd.f32 %v3230_v61, %v3975_v51  ;;  %v619_v37 = vadd.f32 %v3983_v5, %v463_v32  ;;  %v624_v51 = vadd.f32 %v3235_v18, %v468_v52  ;;  %v774_v4 = vadd.f32 %v4009_v20, %v618_v59  ;;  %v4413_v59 = vld [vmem:[#allocation9_spill] sm:$0xff] }
 0x197   :  { %v4063_v44 = vpop.f32.mrf.mxu0  ;;  %v4065_v45 = vpop.f32.mrf.mxu1 }
 0x198   :  { %4398 = vst [vmem:[#allocation21_spill] sm:$0xff] %v4063_v44  ;;  %4399 = vst [vmem:[#allocation22_spill] sm:$0xff] %v4065_v45  ;;  %v464_v44 = vadd.f32 %v398_v62, %v3961_v40  ;;  %v465_v45 = vadd.f32 %v448_v63, %v3979_v55  ;;  %v470_v40 = vadd.f32 %v3985_v17, %v3977_v54 }
 0x199   :  { %v4071_v34 = vpop.f32.mrf.mxu0  ;;  %v4073_v38 = vpop.f32.mrf.mxu1  ;;  %v625_v62 = vadd.f32 %v3995_v11, %v469_v58  ;;  %v627_v50 = vadd.f32 %v3997_v12, %v471_v41  ;;  %v772_v63 = vadd.f32 %v4003_v14, %v616_v56  ;;  %v780_v54 = vadd.f32 %v4005_v15, %v624_v51  ;;  %v4410_v56 = vld [vmem:[#allocation13_spill] sm:$0xff]  ;;  %v4411_v33 = vld [vmem:[#allocation16_spill] sm:$0xff] }
 0x19a   :  { %v620_v55 = vadd.f32 %v3987_v6, %v464_v44  ;;  %v626_v1 = vadd.f32 %v3999_v16, %v470_v40  ;;  %v621_v2 = vadd.f32 %v4001_v13, %v465_v45  ;;  %v775_v6 = vadd.f32 %v4011_v21, %v619_v37  ;;  %v4405_v44 = vld [vmem:[#allocation15_spill] sm:$0xff] }
 0x19b   :  { %v4081_v57 = vpop.f32.mrf.mxu0  ;;  %v4083_v47 = vpop.f32.mrf.mxu1  ;;  %v783_v7 = vadd.f32 %v4013_v22, %v627_v50  ;;  %v928_v18 = vadd.f32 %v4021_v26, %v772_v63  ;;  %v936_v9 = vadd.f32 %v3247_v36, %v780_v54  ;;  %v778_v12 = vadd.f32 %v4019_v25, %v622_v42  ;;  %v4401_v26 = vld [vmem:[#allocation5_spill] sm:$0xff]  ;;  %v4404_v36 = vld [vmem:[#allocation14_spill] sm:$0xff] }
 0x19c   :  { %v776_v10 = vadd.f32 %v4015_v23, %v620_v55  ;;  %v777_v11 = vadd.f32 %v4017_v24, %v621_v2  ;;  %v779_v16 = vadd.f32 %v4023_v27, %v623_v46  ;;  %v929_v15 = vadd.f32 %v4025_v28, %v773_v3  ;;  %v4402_v23 = vld [vmem:[#allocation6_spill] sm:$0xff]  ;;  %v4403_v24 = vld [vmem:[#allocation7_spill] sm:$0xff] }
 0x19d   :  { %v4094_v60 = vpop.f32.mrf.mxu1  ;;  %v3259_v61 = vpop.f32.mrf.mxu0  ;;  %v930_v19 = vadd.f32 %v4039_v39, %v774_v4  ;;  %v1084_v20 = vadd.f32 %v1016_v48, %v928_v18  ;;  %v1092_v21 = vadd.f32 %v3253_v49, %v936_v9  ;;  %v781_v22 = vadd.f32 %v4027_v29, %v625_v62  ;;  %v4408_v29 = vld [vmem:[#allocation8_spill] sm:$0xff]  ;;  %v4414_v62 = vld [vmem:[#allocation17_spill] sm:$0xff]  ;;  %v4415_v63 = vld [vmem:[#allocation18_spill] sm:$0xff] }
 0x19e   :  { %v931_v31 = vadd.f32 %v4401_v26, %v775_v6  ;;  %v782_v32 = vadd.f32 %v4402_v23, %v626_v1  ;;  %v932_v35 = vadd.f32 %v4403_v24, %v776_v10  ;;  %v1085_v41 = vadd.f32 %v4404_v36, %v929_v15  ;;  %v4127_v39 = vpop.permute.xlu1 %1420  ;;  %v4129_v48 = vpop.permute.xlu0 %1410  ;;  %v4416_v1 = vld [vmem:[#allocation19_spill] sm:$0xff]  ;;  %v4417_v10 = vld [vmem:[#allocation20_spill] sm:$0xff]  ;;  %v4419_v23 = vld [vmem:[#allocation10_spill] sm:$0xff] }
 0x19f   :  { %v4106_v5 = vpop.f32.mrf.mxu1  ;;  %v1225_v17 = vpop.f32.mrf.mxu0  ;;  %v1086_v45 = vadd.f32 %v4405_v44, %v930_v19  ;;  %v1240_v28 = vadd.f32 %v1172_v8, %v1084_v20  ;;  %v1248_v52 = vadd.f32 %v3259_v61, %v1092_v21  ;;  %4406 = vst [vmem:[#allocation5_spill] sm:$0xff] %v4127_v39  ;;  %4407 = vst [vmem:[#allocation6_spill] sm:$0xff] %v4129_v48  ;;  %v4412_v51 = vld [vmem:[#allocation22_spill] sm:$0xff] }
 0x1a0   :  { %v934_v49 = vadd.f32 %v4408_v29, %v778_v12  ;;  %v939_v30 = vadd.f32 %v4409_v53, %v783_v7  ;;  %v933_v43 = vadd.f32 %v4410_v56, %v777_v11  ;;  %v1087_v58 = vadd.f32 %v4411_v33, %v931_v31 }
 0x1a1   :  { %v4115_v13 = vpop.f32.mrf.mxu1  ;;  %v3260_v14 = vpop.f32.mrf.mxu0  ;;  %v1241_v55 = vadd.f32 %v4412_v51, %v1085_v41  ;;  %v1242_v42 = vadd.f32 %v1225_v17, %v1086_v45  ;;  %v935_v61 = vadd.f32 %v4413_v59, %v779_v16  ;;  %v1088_v54 = vadd.f32 %v4415_v63, %v932_v35  ;;  %v4420_v35 = vld [vmem:[#allocation21_spill] sm:$0xff] }
 0x1a2   :  { %v1095_v50 = vadd.f32 %v4414_v62, %v939_v30  ;;  %v1089_v2 = vadd.f32 %v4416_v1, %v933_v43  ;;  %v1243_v6 = vadd.f32 %v4073_v38, %v1087_v58  ;;  %v1090_v17 = vadd.f32 %v4417_v10, %v934_v49  ;;  %v4147_v38 = vpop.permute.xlu0 %1425  ;;  %v4421_v49 = vld [vmem:[#allocation12_spill] sm:$0xff] }
 0x1a3   :  { %v4123_v25 = vpop.f32.mrf.mxu1  ;;  %v1228_v27 = vpop.f32.mrf.mxu0  ;;  %v1244_v11 = vadd.f32 %v4083_v47, %v1088_v54  ;;  %4418 = vst [vmem:[#allocation7_spill] sm:$0xff] %v4147_v38  ;;  %v937_v24 = vadd.f32 %v4419_v23, %v781_v22  ;;  %v1091_v36 = vadd.f32 %v4420_v35, %v935_v61  ;;  %v938_v53 = vadd.f32 %v4421_v49, %v782_v32 }
 0x1a4   :  { %v1251_v12 = vadd.f32 %v3260_v14, %v1095_v50  ;;  %v1245_v41 = vadd.f32 %v1228_v27, %v1089_v2  ;;  %v1246_v45 = vadd.f32 %v4094_v60, %v1090_v17 }
 0x1a5   :  { %v1328_v37 = vpop.f32.mrf.mxu0  ;;  %v3265_v40 = vpop.f32.mrf.mxu1  ;;  %v1093_v30 = vadd.f32 %v4071_v34, %v937_v24  ;;  %v1247_v27 = vadd.f32 %v4106_v5, %v1091_v36  ;;  %v1094_v34 = vadd.f32 %v4081_v57, %v938_v53 }
 0x1a6   :  { %v1396_v46 = vadd.f32 %v1328_v37, %v1240_v28  ;;  %v1404_v8 = vadd.f32 %v3265_v40, %v1248_v52 }
 0x1a7   :  { %v1330_v3 = vpop.f32.mrf.mxu0  ;;  %v1381_v4 = vpop.f32.mrf.mxu1  ;;  %v1250_v62 = vadd.f32 %v4123_v25, %v1094_v34 }
 0x1a8   :  { %v1397_v7 = vadd.f32 %v1330_v3, %v1241_v55  ;;  %v1398_v18 = vadd.f32 %v1381_v4, %v1242_v42  ;;  %v1436_v9 = vadd.f32 %v4127_v39, %v1404_v8  ;;  %v1428_v16 = vadd.f32 %v4129_v48, %v1396_v46 }
 0x1a9   :  { %v1332_v15 = vpop.f32.mrf.mxu0  ;;  %v3266_v19 = vpop.f32.mrf.mxu1  ;;  %v1249_v42 = vadd.f32 %v4115_v13, %v1093_v30 }
 0x1aa   :  { %v3148_v20 = vpack.c.bf16 %v1436_v9, %v1436_v9  ;;  %v1429_v21 = vadd.f32 %v4129_v48, %v1397_v7  ;;  %v1430_v26 = vadd.f32 %v4129_v48, %v1398_v18  ;;  %v1399_v31 = vadd.f32 %v1332_v15, %v1243_v6 }
 0x1ab   :  { %v1407_v44 = vadd.f32 %v3266_v19, %v1251_v12  ;;  %v1334_v47 = vpop.f32.mrf.mxu0  ;;  %v1384_v14 = vpop.f32.mrf.mxu1 }
 0x1ac   :  { %1485 = vst [vmem:[#allocation2 + $0x20] sm:$0xf] %v3148_v20  ;;  %v3143_v28 = vpack.c.bf16 %v1429_v21, %v1428_v16  ;;  %v3144_v52 = vpack.c.bf16 %v1430_v26, %v1430_v26  ;;  %v1400_v29 = vadd.f32 %v1334_v47, %v1244_v11  ;;  %v1401_v56 = vadd.f32 %v1384_v14, %v1245_v41 }
 0x1ad   :  { %v1439_v43 = vadd.f32 %v4147_v38, %v1407_v44  ;;  %v1338_v22 = vpop.f32.mrf.mxu0  ;;  %v1586_v33 = vpop.f32.mrf.mxu1  ;;  %v1431_v58 = vadd.f32 %v4100_v0, %v1399_v31 }
 0x1ae   :  { %1480 = vst [vmem:[#allocation2] sm:$0xff] %v3143_v28  ;;  %1481 = vst [vmem:[#allocation2 + $0x8] sm:$0xf] %v3144_v52  ;;  %v1432_v60 = vadd.f32 %v4100_v0, %v1400_v29  ;;  %v1402_v37 = vadd.f32 %v1338_v22, %v1246_v45  ;;  %v1433_v40 = vadd.f32 %v4100_v0, %v1401_v56 }
 0x1af   :  { %v3150_v51 = vpack.c.bf16 %v1439_v43, %v1439_v43  ;;  %v1340_v32 = vpop.f32.mrf.mxu0  ;;  %v1588_v55 = vpop.f32.mrf.mxu1 }
 0x1b0   :  { %v3145_v46 = vpack.c.bf16 %v1432_v60, %v1431_v58  ;;  %v1403_v8 = vadd.f32 %v1340_v32, %v1247_v27  ;;  %v3146_v59 = vpack.c.bf16 %v1433_v40, %v1433_v40  ;;  %v1434_v50 = vadd.f32 %v4127_v39, %v1402_v37 }
 0x1b1   :  { %1487 = vst [vmem:[#allocation2 + $0x2c] sm:$0xf] %v3150_v51  ;;  %v1342_v5 = vpop.f32.mrf.mxu0  ;;  %v1590_v61 = vpop.f32.mrf.mxu1 }
 0x1b2   :  { %1482 = vst [vmem:[#allocation2 + $0xc] sm:$0xff] %v3145_v46  ;;  %v1435_v63 = vadd.f32 %v4127_v39, %v1403_v8  ;;  %v1405_v54 = vadd.f32 %v1342_v5, %v1249_v42  ;;  %1483 = vst [vmem:[#allocation2 + $0x14] sm:$0xf] %v3146_v59 }
 0x1b3   :  { %v1344_v1 = vpop.f32.mrf.mxu0  ;;  %v1592_v2 = vpop.f32.mrf.mxu1 }
 0x1b4   :  { %v3147_v57 = vpack.c.bf16 %v1435_v63, %v1434_v50  ;;  %v1406_v3 = vadd.f32 %v1344_v1, %v1250_v62  ;;  %v1437_v6 = vadd.f32 %v4147_v38, %v1405_v54 }
 0x1b5   :  { %v1596_v13 = vpop.f32.mrf.mxu1  ;;  %v3271_v4 = vpop.f32.mrf.mxu0 }
 0x1b6   :  { %1484 = vst [vmem:[#allocation2 + $0x18] sm:$0xff] %v3147_v57  ;;  %v1438_v7 = vadd.f32 %v4147_v38, %v1406_v3 }
 0x1b7   :  { %v1598_v18 = vpop.f32.mrf.mxu1  ;;  %v1639_v25 = vpop.f32.mrf.mxu0 }
 0x1b8   :  { %v3149_v9 = vpack.c.bf16 %v1438_v7, %v1437_v6 }
 0x1b9   :  { %v1600_v10 = vpop.f32.mrf.mxu1  ;;  %v3272_v17 = vpop.f32.mrf.mxu0 }
 0x1ba   :  { %1486 = vst [vmem:[#allocation2 + $0x24] sm:$0xff] %v3149_v9 }
 0x1bb   :  { %v1602_v11 = vpop.f32.mrf.mxu1  ;;  %v1642_v12 = vpop.f32.mrf.mxu0 }
 0x1bd   :  { %v1713_v16 = vpop.f32.mrf.mxu0  ;;  %v3277_v15 = vpop.f32.mrf.mxu1 }
 0x1be   :  { %v4166_v19 = vadd.f32 %v1713_v16, %v1586_v33  ;;  %v4168_v20 = vadd.f32 %v3277_v15, %v3271_v4 }
 0x1bf   :  { %v1715_v21 = vpop.f32.mrf.mxu0  ;;  %v1766_v26 = vpop.f32.mrf.mxu1 }
 0x1c0   :  { %v4170_v31 = vadd.f32 %v1715_v21, %v1588_v55  ;;  %v4172_v23 = vadd.f32 %v1766_v26, %v1639_v25 }
 0x1c1   :  { %v1717_v24 = vpop.f32.mrf.mxu0  ;;  %v3278_v35 = vpop.f32.mrf.mxu1 }
 0x1c2   :  { %v4174_v36 = vadd.f32 %v1717_v24, %v1590_v61  ;;  %v4176_v41 = vadd.f32 %v3278_v35, %v3272_v17 }
 0x1c3   :  { %v1719_v44 = vpop.f32.mrf.mxu0  ;;  %v1769_v47 = vpop.f32.mrf.mxu1 }
 0x1c4   :  { %v4178_v14 = vadd.f32 %v1719_v44, %v1592_v2  ;;  %v4180_v45 = vadd.f32 %v1769_v47, %v1642_v12 }
 0x1c5   :  { %v1723_v28 = vpop.f32.mrf.mxu0  ;;  %v4182_v52 = vpop.f32.mrf.mxu1 }
 0x1c6   :  { %v4184_v29 = vadd.f32 %v1723_v28, %v1596_v13 }
 0x1c7   :  { %v1725_v49 = vpop.f32.mrf.mxu0  ;;  %v4186_v53 = vpop.f32.mrf.mxu1 }
 0x1c8   :  { %v4188_v30 = vadd.f32 %v1725_v49, %v1598_v18 }
 0x1c9   :  { %v1727_v56 = vpop.f32.mrf.mxu0  ;;  %v4190_v43 = vpop.f32.mrf.mxu1 }
 0x1ca   :  { %v4192_v22 = vadd.f32 %v1727_v56, %v1600_v10 }
 0x1cb   :  { %v1729_v33 = vpop.f32.mrf.mxu0  ;;  %v1861_v27 = vpop.f32.mrf.mxu1 }
 0x1cc   :  { %v4194_v58 = vadd.f32 %v1729_v33, %v1602_v11 }
 0x1cd   :  { %v1865_v60 = vpop.f32.mrf.mxu1  ;;  %v3283_v37 = vpop.f32.mrf.mxu0 }
 0x1cf   :  { %v4196_v40 = vpop.f32.mrf.mxu1  ;;  %v4198_v51 = vpop.f32.mrf.mxu0 }
 0x1d1   :  { %v4200_v32 = vpop.f32.mrf.mxu1  ;;  %v4202_v55 = vpop.f32.mrf.mxu0 }
 0x1d3   :  { %v4204_v34 = vpop.f32.mrf.mxu1  ;;  %v4206_v42 = vpop.f32.mrf.mxu0 }
 0x1d5   :  { %v2009_v46 = vpop.f32.mrf.mxu0  ;;  %v4208_v8 = vpop.f32.mrf.mxu1 }
 0x1d7   :  { %v2011_v59 = vpop.f32.mrf.mxu0  ;;  %v4210_v5 = vpop.f32.mrf.mxu1 }
 0x1d9   :  { %v4212_v61 = vpop.f32.mrf.mxu0  ;;  %v4214_v62 = vpop.f32.mrf.mxu1 }
 0x1db   :  { %v4216_v50 = vpop.f32.mrf.mxu0  ;;  %v4218_v63 = vpop.f32.mrf.mxu1 }
 0x1dd   :  { %v4220_v54 = vpop.f32.mrf.mxu0  ;;  %v2163_v1 = vpop.f32.mrf.mxu1 }
 0x1df   :  { %v4222_v2 = vpop.f32.mrf.mxu0  ;;  %v2165_v57 = vpop.f32.mrf.mxu1 }
 0x1e1   :  { %v4224_v3 = vpop.f32.mrf.mxu0  ;;  %v4226_v13 = vpop.f32.mrf.mxu1 }
 0x1e3   :  { %v4228_v4 = vpop.f32.mrf.mxu0  ;;  %v4230_v6 = vpop.f32.mrf.mxu1 }
 0x1e5   :  { %v4232_v7 = vpop.f32.mrf.mxu1  ;;  %v4234_v18 = vpop.f32.mrf.mxu0 }
 0x1e7   :  { %v4236_v25 = vpop.f32.mrf.mxu1  ;;  %v4238_v9 = vpop.f32.mrf.mxu0 }
 0x1e9   :  { %v4240_v10 = vpop.f32.mrf.mxu1  ;;  %v4242_v17 = vpop.f32.mrf.mxu0 }
 0x1eb   :  { %v4244_v11 = vpop.f32.mrf.mxu1  ;;  %v4246_v12 = vpop.f32.mrf.mxu0 }
 0x1ec   :  { %4422 = vst [vmem:[#allocation14_spill] sm:$0xff] %v4244_v11  ;;  %4423 = vst [vmem:[#allocation15_spill] sm:$0xff] %v4246_v12 }
 0x1ed   :  { %v2317_v16 = vpop.f32.mrf.mxu0  ;;  %v4248_v15 = vpop.f32.mrf.mxu1 }
 0x1ee   :  { %4424 = vst [vmem:[#allocation8_spill] sm:$0xff] %v4248_v15 }
 0x1ef   :  { %v2319_v21 = vpop.f32.mrf.mxu0  ;;  %v4250_v26 = vpop.f32.mrf.mxu1 }
 0x1f0   :  { %4425 = vst [vmem:[#allocation11_spill] sm:$0xff] %v4250_v26 }
 0x1f1   :  { %v2321_v24 = vpop.f32.mrf.mxu0  ;;  %v4252_v35 = vpop.f32.mrf.mxu1 }
 0x1f2   :  { %4426 = vst [vmem:[#allocation13_spill] sm:$0xff] %v4252_v35 }
 0x1f3   :  { %v4254_v44 = vpop.f32.mrf.mxu0  ;;  %v4256_v47 = vpop.f32.mrf.mxu1 }
 0x1f4   :  { %4427 = vst [vmem:[#allocation16_spill] sm:$0xff] %v4256_v47 }
 0x1f5   :  { %v4258_v28 = vpop.f32.mrf.mxu0  ;;  %v2471_v49 = vpop.f32.mrf.mxu1 }
 0x1f6   :  { %4428 = vst [vmem:[#allocation22_spill] sm:$0xff] %v4258_v28 }
 0x1f7   :  { %v4260_v56 = vpop.f32.mrf.mxu0  ;;  %v2473_v33 = vpop.f32.mrf.mxu1 }
 0x1f8   :  { %4429 = vst [vmem:[#allocation9_spill] sm:$0xff] %v4260_v56 }
 0x1f9   :  { %v4262_v38 = vpop.f32.mrf.mxu0  ;;  %v2475_v39 = vpop.f32.mrf.mxu1 }
 0x1fa   :  { %4430 = vst [vmem:[#allocation17_spill] sm:$0xff] %v4262_v38  ;;  %v1923_v38 = vadd.f32 %v4182_v52, %v4166_v19  ;;  %v1930_v19 = vadd.f32 %v4196_v40, %v4188_v30  ;;  %v1925_v52 = vadd.f32 %v4198_v51, %v4172_v23 }
 0x1fb   :  { %v4264_v0 = vpop.f32.mrf.mxu0  ;;  %v4266_v48 = vpop.f32.mrf.mxu1 }
 0x1fc   :  { %4431 = vst [vmem:[#allocation18_spill] sm:$0xff] %v4264_v0  ;;  %4432 = vst [vmem:[#allocation19_spill] sm:$0xff] %v4266_v48  ;;  %v2077_v48 = vadd.f32 %v2009_v46, %v1923_v38 }
 0x1fd   :  { %v4268_v26 = vpop.f32.mrf.mxu1  ;;  %v4270_v35 = vpop.f32.mrf.mxu0 }
 0x1fe   :  { %4433 = vst [vmem:[#allocation20_spill] sm:$0xff] %v4268_v26  ;;  %4434 = vst [vmem:[#allocation10_spill] sm:$0xff] %v4270_v35  ;;  %v1924_v26 = vadd.f32 %v4186_v53, %v4170_v31  ;;  %v2231_v38 = vadd.f32 %v2163_v1, %v2077_v48 }
 0x1ff   :  { %v4272_v12 = vpop.f32.mrf.mxu1  ;;  %v4274_v47 = vpop.f32.mrf.mxu0 }
 0x200   :  { %4435 = vst [vmem:[#allocation21_spill] sm:$0xff] %v4272_v12  ;;  %4436 = vst [vmem:[#allocation12_spill] sm:$0xff] %v4274_v47  ;;  %v1926_v12 = vadd.f32 %v4190_v43, %v4174_v36  ;;  %v1927_v47 = vadd.f32 %v1861_v27, %v4178_v14  ;;  %v2078_v31 = vadd.f32 %v2011_v59, %v1924_v26  ;;  %v4440_v26 = vld [vmem:[#allocation8_spill] sm:$0xff] }
 0x201   :  { %v4276_v28 = vpop.f32.mrf.mxu1  ;;  %v4278_v15 = vpop.f32.mrf.mxu0  ;;  %v1932_v36 = vadd.f32 %v4200_v32, %v4192_v22  ;;  %v1934_v14 = vadd.f32 %v4202_v55, %v4176_v41  ;;  %v2385_v27 = vadd.f32 %v2317_v16, %v2231_v38  ;;  %v2079_v22 = vadd.f32 %v4210_v5, %v1925_v52  ;;  %v4445_v52 = vld [vmem:[#allocation9_spill] sm:$0xff] }
 0x202   :  { %4437 = vst [vmem:[#allocation24_spill] sm:$0xff] %v4276_v28  ;;  %4438 = vst [vmem:[#allocation25_spill] sm:$0xff] %v4278_v15  ;;  %v1929_v28 = vadd.f32 %v1865_v60, %v4184_v29  ;;  %v1931_v15 = vadd.f32 %v3283_v37, %v4168_v20  ;;  %v1933_v20 = vadd.f32 %v4204_v34, %v4194_v58 }
 0x203   :  { %v4282_v56 = vpop.f32.mrf.mxu1  ;;  %v4284_v0 = vpop.f32.mrf.mxu0  ;;  %v1928_v29 = vadd.f32 %v4206_v42, %v4180_v45  ;;  %v2080_v23 = vadd.f32 %v4212_v61, %v1926_v12  ;;  %v2232_v48 = vadd.f32 %v2165_v57, %v2078_v31  ;;  %v2088_v60 = vadd.f32 %v4214_v62, %v1934_v14 }
 0x204   :  { %v2085_v30 = vadd.f32 %v4208_v8, %v1931_v15  ;;  %v2081_v41 = vadd.f32 %v4216_v50, %v1927_v47  ;;  %v2083_v45 = vadd.f32 %v4220_v54, %v1929_v28  ;;  %v2539_v55 = vadd.f32 %v2471_v49, %v2385_v27  ;;  %v4439_v15 = vld [vmem:[#allocation14_spill] sm:$0xff] }
 0x205   :  { %v2625_v35 = vpop.f32.mrf.mxu0  ;;  %v4293_v11 = vpop.f32.mrf.mxu1  ;;  %v2082_v58 = vadd.f32 %v4218_v63, %v1928_v29  ;;  %v2234_v51 = vadd.f32 %v4226_v13, %v2080_v23  ;;  %v2386_v32 = vadd.f32 %v2319_v21, %v2232_v48  ;;  %v2084_v34 = vadd.f32 %v4222_v2, %v1930_v19  ;;  %v4446_v38 = vld [vmem:[#allocation20_spill] sm:$0xff] }
 0x206   :  { %v2086_v42 = vadd.f32 %v4224_v3, %v1932_v36  ;;  %v2087_v46 = vadd.f32 %v4228_v4, %v1933_v20  ;;  %v2235_v8 = vadd.f32 %v4230_v6, %v2081_v41  ;;  %v2237_v61 = vadd.f32 %v4232_v7, %v2083_v45  ;;  %v4447_v36 = vld [vmem:[#allocation10_spill] sm:$0xff]  ;;  %v4450_v41 = vld [vmem:[#allocation17_spill] sm:$0xff] }
 0x207   :  { %v2627_v53 = vpop.f32.mrf.mxu0  ;;  %v4307_v43 = vpop.f32.mrf.mxu1  ;;  %v2388_v62 = vadd.f32 %v2321_v24, %v2234_v51  ;;  %v2540_v50 = vadd.f32 %v2473_v33, %v2386_v32  ;;  %v2693_v63 = vadd.f32 %v2625_v35, %v2539_v55  ;;  %v2239_v54 = vadd.f32 %v4234_v18, %v2085_v30  ;;  %v4441_v18 = vld [vmem:[#allocation22_spill] sm:$0xff]  ;;  %v4452_v51 = vld [vmem:[#allocation21_spill] sm:$0xff] }
 0x208   :  { %v2238_v1 = vadd.f32 %v4236_v25, %v2084_v34  ;;  %v2233_v2 = vadd.f32 %v4238_v9, %v2079_v22  ;;  %v2240_v57 = vadd.f32 %v4240_v10, %v2086_v42  ;;  %v2389_v4 = vadd.f32 %v4254_v44, %v2235_v8  ;;  %v4442_v9 = vld [vmem:[#allocation15_spill] sm:$0xff]  ;;  %v4448_v30 = vld [vmem:[#allocation6_spill] sm:$0xff]  ;;  %v4449_v22 = vld [vmem:[#allocation13_spill] sm:$0xff] }
 0x209   :  { %v2629_v37 = vpop.f32.mrf.mxu0  ;;  %v4315_v40 = vpop.f32.mrf.mxu1  ;;  %v2542_v6 = vadd.f32 %v2475_v39, %v2388_v62  ;;  %v2694_v12 = vadd.f32 %v2627_v53, %v2540_v50  ;;  %v2242_v7 = vadd.f32 %v4242_v17, %v2088_v60  ;;  %v2241_v21 = vadd.f32 %v4439_v15, %v2087_v46  ;;  %v4443_v10 = vld [vmem:[#allocation19_spill] sm:$0xff]  ;;  %v4454_v50 = vld [vmem:[#allocation24_spill] sm:$0xff] }
 0x20a   :  { %v2393_v24 = vadd.f32 %v4440_v26, %v2239_v54  ;;  %v2391_v35 = vadd.f32 %v4441_v18, %v2237_v61  ;;  %v2236_v28 = vadd.f32 %v4442_v9, %v2082_v58  ;;  %v2543_v49 = vadd.f32 %v4443_v10, %v2389_v4  ;;  %v4444_v44 = vld [vmem:[#allocation11_spill] sm:$0xff]  ;;  %v4453_v61 = vld [vmem:[#allocation12_spill] sm:$0xff]  ;;  %v4455_v54 = vld [vmem:[#allocation25_spill] sm:$0xff] }
 0x20b   :  { %v2631_v59 = vpop.f32.mrf.mxu0  ;;  %v4323_v5 = vpop.f32.mrf.mxu1  ;;  %v2696_v33 = vadd.f32 %v2629_v37, %v2542_v6  ;;  %v2387_v39 = vadd.f32 %v4444_v44, %v2233_v2  ;;  %v2392_v31 = vadd.f32 %v4445_v52, %v2238_v1  ;;  %v2396_v60 = vadd.f32 %v4449_v22, %v2242_v7  ;;  %v4451_v37 = vld [vmem:[#allocation18_spill] sm:$0xff]  ;;  %v4456_v4 = vld [vmem:[#allocation23_spill] sm:$0xff] }
 0x20c   :  { %v2545_v17 = vadd.f32 %v4446_v38, %v2391_v35  ;;  %v2547_v14 = vadd.f32 %v4447_v36, %v2393_v24  ;;  %v2697_v53 = vadd.f32 %v2631_v59, %v2543_v49  ;;  %v2394_v58 = vadd.f32 %v4450_v41, %v2240_v57 }
 0x20d   :  { %v2635_v3 = vpop.f32.mrf.mxu0  ;;  %v2779_v13 = vpop.f32.mrf.mxu1  ;;  %v2395_v45 = vadd.f32 %v4451_v37, %v2241_v21  ;;  %v2546_v32 = vadd.f32 %v4452_v51, %v2392_v31  ;;  %v2541_v62 = vadd.f32 %v4453_v61, %v2387_v39  ;;  %v2550_v1 = vadd.f32 %v4455_v54, %v2396_v60 }
 0x20e   :  { %v2847_v16 = vadd.f32 %v2779_v13, %v2693_v63  ;;  %v2701_v42 = vadd.f32 %v4293_v11, %v2547_v14  ;;  %v2699_v46 = vadd.f32 %v2635_v3, %v2545_v17  ;;  %v2548_v63 = vadd.f32 %v4454_v50, %v2394_v58  ;;  %v4457_v11 = vld [vmem:[#allocation16_spill] sm:$0xff]  ;;  %v4459_v14 = vld [vmem:[#allocation7_spill] sm:$0xff] }
 0x20f   :  { %v2637_v25 = vpop.f32.mrf.mxu0  ;;  %v2781_v47 = vpop.f32.mrf.mxu1  ;;  %v2390_v3 = vadd.f32 %v4457_v11, %v2236_v28  ;;  %v2549_v15 = vadd.f32 %v4282_v56, %v2395_v45  ;;  %v2695_v21 = vadd.f32 %v4307_v43, %v2541_v62  ;;  %v2704_v26 = vadd.f32 %v4315_v40, %v2550_v1 }
 0x210   :  { %v2848_v19 = vadd.f32 %v2781_v47, %v2694_v12  ;;  %v2859_v23 = vadd.f32 %v2847_v16, %v4448_v30  ;;  %v2700_v2 = vadd.f32 %v2637_v25, %v2546_v32  ;;  %v4458_v47 = vld [vmem:[#allocation5_spill] sm:$0xff] }
 0x211   :  { %v2639_v20 = vpop.f32.mrf.mxu0  ;;  %v2783_v29 = vpop.f32.mrf.mxu1  ;;  %v2544_v49 = vadd.f32 %v4284_v0, %v2390_v3 }
 0x212   :  { %v2860_v48 = vadd.f32 %v2848_v19, %v4448_v30  ;;  %v2850_v27 = vadd.f32 %v2783_v29, %v2696_v33  ;;  %v2702_v35 = vadd.f32 %v2639_v20, %v2548_v63 }
 0x213   :  { %v2641_v55 = vpop.f32.mrf.mxu0  ;;  %v2785_v34 = vpop.f32.mrf.mxu1  ;;  %v2698_v31 = vadd.f32 %v4323_v5, %v2544_v49 }
 0x214   :  { %v3151_v8 = vpack.c.bf16 %v2860_v48, %v2859_v23  ;;  %v2851_v59 = vadd.f32 %v2785_v34, %v2697_v53  ;;  %v2862_v6 = vadd.f32 %v2850_v27, %v4456_v4  ;;  %v2703_v33 = vadd.f32 %v2641_v55, %v2549_v15 }
 0x215   :  { %v2789_v13 = vpop.f32.mrf.mxu1  ;;  %v3319_v57 = vpop.f32.mrf.mxu0 }
 0x216   :  { %2912 = vst [vmem:[#allocation2 + $0x30] sm:$0xff] %v3151_v8  ;;  %v2863_v12 = vadd.f32 %v2851_v59, %v4456_v4  ;;  %v2853_v16 = vadd.f32 %v2789_v13, %v2699_v46  ;;  %v2855_v7 = vadd.f32 %v3319_v57, %v2701_v42 }
 0x217   :  { %v2791_v24 = vpop.f32.mrf.mxu1  ;;  %v2832_v18 = vpop.f32.mrf.mxu0 }
 0x218   :  { %v3153_v25 = vpack.c.bf16 %v2863_v12, %v2862_v6  ;;  %v2867_v9 = vadd.f32 %v2855_v7, %v4458_v47  ;;  %v2854_v10 = vadd.f32 %v2791_v24, %v2700_v2  ;;  %v2865_v19 = vadd.f32 %v2853_v16, %v4458_v47 }
 0x219   :  { %v2849_v44 = vadd.f32 %v2832_v18, %v2695_v21  ;;  %v2793_v28 = vpop.f32.mrf.mxu1  ;;  %v3320_v39 = vpop.f32.mrf.mxu0 }
 0x21a   :  { %2914 = vst [vmem:[#allocation2 + $0x3c] sm:$0xff] %v3153_v25  ;;  %v3156_v56 = vpack.c.bf16 %v2867_v9, %v2867_v9  ;;  %v2866_v43 = vadd.f32 %v2854_v10, %v4458_v47  ;;  %v2856_v40 = vadd.f32 %v2793_v28, %v2702_v35  ;;  %v2858_v52 = vadd.f32 %v3320_v39, %v2704_v26 }
 0x21b   :  { %v2861_v38 = vadd.f32 %v2849_v44, %v4448_v30  ;;  %v2795_v17 = vpop.f32.mrf.mxu1  ;;  %v2835_v36 = vpop.f32.mrf.mxu0 }
 0x21c   :  { %2917 = vst [vmem:[#allocation2 + $0x50] sm:$0xf] %v3156_v56  ;;  %v3155_v0 = vpack.c.bf16 %v2866_v43, %v2865_v19  ;;  %v2870_v20 = vadd.f32 %v2858_v52, %v4459_v14  ;;  %v2857_v29 = vadd.f32 %v2795_v17, %v2703_v33  ;;  %v2852_v23 = vadd.f32 %v2835_v36, %v2698_v31 }
 0x21d   :  { %v3152_v53 = vpack.c.bf16 %v2861_v38, %v2861_v38  ;;  %v2868_v48 = vadd.f32 %v2856_v40, %v4459_v14 }
 0x21e   :  { %2916 = vst [vmem:[#allocation2 + $0x48] sm:$0xff] %v3155_v0  ;;  %v3158_v27 = vpack.c.bf16 %v2870_v20, %v2870_v20  ;;  %v2869_v22 = vadd.f32 %v2857_v29, %v4459_v14  ;;  %v2864_v5 = vadd.f32 %v2852_v23, %v4456_v4 }
 0x21f   :  { %2913 = vst [vmem:[#allocation2 + $0x38] sm:$0xf] %v3152_v53 }
 0x220   :  { %2919 = vst [vmem:[#allocation2 + $0x5c] sm:$0xf] %v3158_v27  ;;  %v3157_v30 = vpack.c.bf16 %v2869_v22, %v2868_v48  ;;  %v3154_v60 = vpack.c.bf16 %v2864_v5, %v2864_v5 }
 0x222   :  { %2918 = vst [vmem:[#allocation2 + $0x54] sm:$0xff] %v3157_v30  ;;  %2915 = vst [vmem:[#allocation2 + $0x44] sm:$0xf] %v3154_v60 }
 0x223   :  { %3403 = shalt.err (!%p3400_p4)
}
 0x224   :  { %s3425_s20 = smov 192   ;;  %s3426_s21 = smov 12  }
 0x225   :  { %2931 = dma.vmem_to_hbm [thread:$0]  %s2926_s18, 1536, %s4373_s3, [#allocation3], %s3425_s20, %s3425_s20, %s3426_s21  }
 0x226   :  { %3412 = dma.done.wait [#allocation3], 1536  }
 0x227   :  { %3413 = vsyncadd [#allocation3], 4294965760 }
 0x228   :  { %2935 = vsyncpa [#allocation3], 1 }

</bundles_post_ra>
